<compile_context>
chip_gen: v7x
topology: tpu7x:2x2x1
jax: 0.10.0
libtpu: 0.0.40
codegen_flags: <defaults>
</compile_context>

<pallas_src>
import functools

import jax
import jax.numpy as jnp
from jax.experimental import pallas as pl
from jax.experimental.pallas import tpu as pltpu

# ----------------------------------------------------------------------------
# Model dimensions (scaled-down stand-ins for the 2048-channel backbone).
# ----------------------------------------------------------------------------
IMG_C = 3
IMG_HW = 64          # input spatial size
PATCH = 32           # backbone total stride (stand-in stem stride)
C_FEAT = 128         # stand-in for 2048 backbone output channels
NUM_CLASSES = 40
CLASSES_PAD = 128    # lane-dense head; logits sliced back to NUM_CLASSES


# ----------------------------------------------------------------------------
# Pallas kernel 1: fused matmul + bias (+ optional ReLU) — used for the stem.
#   bf16 MXU operands, f32 accumulation, bf16 store.
# ----------------------------------------------------------------------------
def _matmul_bias_kernel(x_ref, w_ref, b_ref, o_ref, *, activation):
    y = jnp.dot(x_ref[...], w_ref[...], preferred_element_type=jnp.float32)
    y = y + b_ref[...]
    if activation == "relu":
        y = jnp.maximum(y, 0.0)
    o_ref[...] = y.astype(o_ref.dtype)


def matmul_bias(x, w, b, activation="none", tm=None, out_dtype=jnp.float32):
    M, K = x.shape
    K2, N = w.shape
    assert K == K2
    if tm is None:
        tm = M                       # single block at toy size (grid=(1,))
    assert M % tm == 0, f"M={M} must be divisible by tm={tm}"
    grid_m = M // tm
    return pl.pallas_call(
        functools.partial(_matmul_bias_kernel, activation=activation),
        out_shape=jax.ShapeDtypeStruct((M, N), out_dtype),
        grid=(grid_m,),
        in_specs=[
            pl.BlockSpec((tm, K), lambda i: (i, 0)),
            pl.BlockSpec((K, N), lambda i: (0, 0)),
            pl.BlockSpec((1, N), lambda i: (0, 0)),
        ],
        out_specs=pl.BlockSpec((tm, N), lambda i: (i, 0)),
        compiler_params=pltpu.CompilerParams(
            dimension_semantics=("parallel",)),
    )(x, w, b.reshape(1, N))


# ----------------------------------------------------------------------------
# Pallas kernel 2: fused spatial-level module + global avg pool + last_linear
#   Input: contiguous stem output (2, N, HW, C) bf16  (axis 0 = [left, right]).
#   Grid over batch (parallel on v7x). Reproduces (with a single conv2d_1x1
#   module serving v/k/q, as in the spec):
#     F_*           = conv2d_1x1(x)
#     R_right2left  = sigmoid(F_left_k * F_right_q)  == R_left2right
#     spatial_left  = left_x  * (F_left_v  * R)
#     spatial_right = right_x * (F_right_v * R)
#     pooled = gap(cat([spatial_left, spatial_right], C)); logits = fc(pooled)
# ----------------------------------------------------------------------------
def _spatial_pool_fc_kernel(feat_ref, wc_ref, bc_ref, wf_ref, bf_ref, out_ref):
    left = feat_ref[0, 0]                     # (HW, C) bf16
    right = feat_ref[1, 0]                    # (HW, C) bf16
    wc = wc_ref[...]                          # (C, C)  bf16
    bc = bc_ref[...]                          # (1, C)  f32

    f_left = jnp.dot(left, wc, preferred_element_type=jnp.float32) + bc
    f_right = jnp.dot(right, wc, preferred_element_type=jnp.float32) + bc

    # Same conv2d_1x1 weights for v/k/q  ->  both sigmoid gates are identical.
    r = jax.nn.sigmoid(f_left * f_right)

    spatial_left = left.astype(jnp.float32) * (f_left * r)
    spatial_right = right.astype(jnp.float32) * (f_right * r)

    inv_hw = 1.0 / left.shape[0]              # static; avoids a VPU divide
    pooled_left = jnp.sum(spatial_left, axis=0, keepdims=True) * inv_hw
    pooled_right = jnp.sum(spatial_right, axis=0, keepdims=True) * inv_hw

    # last_linear fused in (no HBM round-trip of pooled); fc weight split by
    # halves instead of concatenating pooled along channels.
    c = wc.shape[0]
    wf = wf_ref[...]                          # (2C, CLASSES_PAD) bf16
    logits = (jnp.dot(pooled_left.astype(jnp.bfloat16), wf[:c],
                      preferred_element_type=jnp.float32)
              + jnp.dot(pooled_right.astype(jnp.bfloat16), wf[c:],
                        preferred_element_type=jnp.float32)
              + bf_ref[...])
    out_ref[0] = logits.astype(out_ref.dtype)


def spatial_pool_fc(feat, w_conv, b_conv, w_fc, b_fc):
    # feat: (2, N, HW, C) bf16, contiguous stem output ([left, right] on axis 0)
    _, N, HW, C = feat.shape
    classes_pad = w_fc.shape[1]
    out = pl.pallas_call(
        _spatial_pool_fc_kernel,
        out_shape=jax.ShapeDtypeStruct((N, 1, classes_pad), jnp.float32),
        grid=(N,),
        in_specs=[
            pl.BlockSpec((2, 1, HW, C), lambda b: (0, b, 0, 0)),
            pl.BlockSpec((C, C), lambda b: (0, 0)),
            pl.BlockSpec((1, C), lambda b: (0, 0)),
            pl.BlockSpec((2 * C, classes_pad), lambda b: (0, 0)),
            pl.BlockSpec((1, classes_pad), lambda b: (0, 0)),
        ],
        out_specs=pl.BlockSpec((1, 1, classes_pad), lambda b: (b, 0, 0)),
        compiler_params=pltpu.CompilerParams(
            dimension_semantics=("parallel",)),
    )(feat, w_conv, b_conv.reshape(1, C), w_fc, b_fc.reshape(1, classes_pad))
    return out.reshape(N, classes_pad)


# ----------------------------------------------------------------------------
# Glue: patchify (pure JAX reshape/transpose) for the stand-in stem conv.
# Cast to bf16 BEFORE the transpose so the copy + stem DMA move half the bytes.
# ----------------------------------------------------------------------------
def patchify(x, patch):
    N, C, H, W = x.shape
    hp, wp = H // patch, W // patch
    x = x.astype(jnp.bfloat16)
    x = x.reshape(N, C, hp, patch, wp, patch)
    x = x.transpose(0, 2, 4, 1, 3, 5)                  # N, Hp, Wp, C, ph, pw
    return x.reshape(N * hp * wp, C * patch * patch), (N, hp, wp)


# ----------------------------------------------------------------------------
# Parameter initialization (deterministic, synthetic). Matmul weights bf16,
# biases f32. fc head is zero-padded from NUM_CLASSES to CLASSES_PAD lanes.
# ----------------------------------------------------------------------------
def init_params(key):
    ks = jax.random.split(key, 6)
    k_in = IMG_C * PATCH * PATCH
    fc_w = (jax.random.normal(ks[4], (2 * C_FEAT, NUM_CLASSES), jnp.float32)
            * (1.0 / jnp.sqrt(2 * C_FEAT)))
    fc_b = jax.random.normal(ks[5], (NUM_CLASSES,), jnp.float32) * 0.01
    pad = CLASSES_PAD - NUM_CLASSES
    return {
        "stem_w": (jax.random.normal(ks[0], (k_in, C_FEAT), jnp.float32)
                   * (1.0 / jnp.sqrt(k_in))).astype(jnp.bfloat16),
        "stem_b": jax.random.normal(ks[1], (C_FEAT,), jnp.float32) * 0.01,
        "conv1x1_w": (jax.random.normal(ks[2], (C_FEAT, C_FEAT), jnp.float32)
                      * (1.0 / jnp.sqrt(C_FEAT))).astype(jnp.bfloat16),
        "conv1x1_b": jax.random.normal(ks[3], (C_FEAT,), jnp.float32) * 0.01,
        "fc_w": jnp.pad(fc_w, ((0, 0), (0, pad))).astype(jnp.bfloat16),
        "fc_b": jnp.pad(fc_b, ((0, pad),)),
    }


# ----------------------------------------------------------------------------
# Forward pass
# ----------------------------------------------------------------------------
@jax.jit
def forward(params, left_x, right_x):
    # Single merged stem over stacked left+right images (one pallas_call).
    x = jnp.concatenate([left_x, right_x], axis=0)        # (2N, C, H, W)
    rows, (two_n, hp, wp) = patchify(x, PATCH)            # bf16 (2N*hw, C*P*P)
    feat = matmul_bias(rows, params["stem_w"], params["stem_b"],
                       activation="relu",
                       out_dtype=jnp.bfloat16)            # (2N*hw, C_FEAT) bf16
    n = two_n // 2
    # Free reshape: rows were produced in [left..., right...] order.
    feat = feat.reshape(2, n, hp * wp, C_FEAT)            # (2, N, HW, C)

    # Fused spatial attention + global avg pool + last_linear (one pallas_call,
    # batch-parallel grid).
    logits = spatial_pool_fc(feat,
                             params["conv1x1_w"], params["conv1x1_b"],
                             params["fc_w"], params["fc_b"])  # (N, 128)
    return logits[:, :NUM_CLASSES]                            # (N, 40)


# ----------------------------------------------------------------------------
if __name__ == "__main__":
    key = jax.random.PRNGKey(0)
    k_params, k_left, k_right = jax.random.split(key, 3)

    params = init_params(k_params)
    left_x = jax.random.normal(k_left, (2, IMG_C, IMG_HW, IMG_HW), jnp.float32)
    right_x = jax.random.normal(k_right, (2, IMG_C, IMG_HW, IMG_HW), jnp.float32)

    out = forward(params, left_x, right_x)
    jax.block_until_ready(out)
    assert out.shape == (2, NUM_CLASSES), out.shape
    print("KERNEL_OK")
</pallas_src>

<mosaic_0001>
module attributes {stable_mosaic.version = 11 : i64} {
  func.func @_matmul_bias_kernel(%arg0: i32, %arg1: memref<16x3072xbf16, #tpu.memory_space<vmem>>, %arg2: memref<3072x128xbf16, #tpu.memory_space<vmem>>, %arg3: memref<1x128xf32, #tpu.memory_space<vmem>>, %arg4: memref<16x128xbf16, #tpu.memory_space<vmem>>) attributes {dimension_semantics = [#tpu.dimension_semantics<parallel>], iteration_bounds = array<i64: 1>, scalar_prefetch = 0 : i64, scratch_operands = 0 : i64, tpu.core_type = #tpu.core_type<tc>, window_params = [{transform_indices = @transform_0, window_bounds = array<i64: 16, 3072>}, {pipeline_mode = #tpu.pipeline_mode<synchronous>, transform_indices = @transform_1, window_bounds = array<i64: 3072, 128>}, {pipeline_mode = #tpu.pipeline_mode<synchronous>, transform_indices = @transform_2, window_bounds = array<i64: 1, 128>}, {transform_indices = @transform_3, window_bounds = array<i64: 16, 128>}]} {
    %c0 = arith.constant 0 : index
    %c0_0 = arith.constant 0 : index
    %0 = vector.load %arg1[%c0, %c0_0] : memref<16x3072xbf16, #tpu.memory_space<vmem>>, vector<16x3072xbf16>
    %c0_1 = arith.constant 0 : index
    %c0_2 = arith.constant 0 : index
    %1 = vector.load %arg2[%c0_1, %c0_2] : memref<3072x128xbf16, #tpu.memory_space<vmem>>, vector<3072x128xbf16>
    %cst = arith.constant dense<0.000000e+00> : vector<16x128xf32>
    %2 = tpu.matmul %0, %1, %cst {dimension_numbers = #tpu.dot_dimension_numbers<[1], [0], [0], [1], [0, 0, 1, 1], [], []>} : vector<16x3072xbf16>, vector<3072x128xbf16>, vector<16x128xf32> -> vector<16x128xf32>
    %c0_3 = arith.constant 0 : index
    %c0_4 = arith.constant 0 : index
    %3 = vector.load %arg3[%c0_3, %c0_4] : memref<1x128xf32, #tpu.memory_space<vmem>>, vector<1x128xf32>
    %4 = vector.broadcast %3 : vector<1x128xf32> to vector<16x128xf32>
    %5 = arith.addf %2, %4 : vector<16x128xf32>
    %cst_5 = arith.constant 0.000000e+00 : f32
    %6 = vector.broadcast %cst_5 : f32 to vector<16x128xf32>
    %7 = arith.maximumf %5, %6 : vector<16x128xf32>
    %8 = arith.truncf %7 : vector<16x128xf32> to vector<16x128xbf16>
    %c0_6 = arith.constant 0 : index
    %c0_7 = arith.constant 0 : index
    %9 = vector.load %arg4[%c0_6, %c0_7] : memref<16x128xbf16, #tpu.memory_space<vmem>>, vector<16x128xbf16>
    tpu.vector_store %arg4[%c0_6, %c0_7], %8 {strides = array<i32>} : memref<16x128xbf16, #tpu.memory_space<vmem>>, vector<16x128xbf16>,
    return
  }
  func.func @transform_0(%arg0: i32) -> (i32, i32) {
    %c0_i32 = arith.constant 0 : i32
    %c0_i32_0 = arith.constant 0 : i32
    return %arg0, %c0_i32 : i32, i32
  }
  func.func @transform_1(%arg0: i32) -> (i32, i32) {
    %c0_i32 = arith.constant 0 : i32
    %c0_i32_0 = arith.constant 0 : i32
    %c0_i32_1 = arith.constant 0 : i32
    return %c0_i32, %c0_i32_0 : i32, i32
  }
  func.func @transform_2(%arg0: i32) -> (i32, i32) {
    %c0_i32 = arith.constant 0 : i32
    %c0_i32_0 = arith.constant 0 : i32
    %c0_i32_1 = arith.constant 0 : i32
    return %c0_i32, %c0_i32_0 : i32, i32
  }
  func.func @transform_3(%arg0: i32) -> (i32, i32) {
    %c0_i32 = arith.constant 0 : i32
    %c0_i32_0 = arith.constant 0 : i32
    return %arg0, %c0_i32 : i32, i32
  }
}

module attributes {stable_mosaic.version = 11 : i64} {
  func.func @_spatial_pool_fc_kernel(%arg0: i32, %arg1: memref<2x1x4x128xbf16, #tpu.memory_space<vmem>>, %arg2: memref<128x128xbf16, #tpu.memory_space<vmem>>, %arg3: memref<1x128xf32, #tpu.memory_space<vmem>>, %arg4: memref<256x128xbf16, #tpu.memory_space<vmem>>, %arg5: memref<1x128xf32, #tpu.memory_space<vmem>>, %arg6: memref<1x1x128xf32, #tpu.memory_space<vmem>>) attributes {dimension_semantics = [#tpu.dimension_semantics<parallel>], iteration_bounds = array<i64: 2>, scalar_prefetch = 0 : i64, scratch_operands = 0 : i64, tpu.core_type = #tpu.core_type<tc>, window_params = [{transform_indices = @transform_0, window_bounds = array<i64: 2, 1, 4, 128>}, {pipeline_mode = #tpu.pipeline_mode<synchronous>, transform_indices = @transform_1, window_bounds = array<i64: 128, 128>}, {pipeline_mode = #tpu.pipeline_mode<synchronous>, transform_indices = @transform_2, window_bounds = array<i64: 1, 128>}, {pipeline_mode = #tpu.pipeline_mode<synchronous>, transform_indices = @transform_3, window_bounds = array<i64: 256, 128>}, {pipeline_mode = #tpu.pipeline_mode<synchronous>, transform_indices = @transform_4, window_bounds = array<i64: 1, 128>}, {transform_indices = @transform_5, window_bounds = array<i64: 1, 1, 128>}]} {
    %c0 = arith.constant 0 : index
    %c0_0 = arith.constant 0 : index
    %c0_1 = arith.constant 0 : index
    %c0_2 = arith.constant 0 : index
    %0 = vector.load %arg1[%c0, %c0_0, %c0_1, %c0_2] : memref<2x1x4x128xbf16, #tpu.memory_space<vmem>>, vector<1x1x4x128xbf16>
    %1 = vector.shape_cast %0 : vector<1x1x4x128xbf16> to vector<4x128xbf16>
    %c1 = arith.constant 1 : index
    %c0_3 = arith.constant 0 : index
    %c0_4 = arith.constant 0 : index
    %c0_5 = arith.constant 0 : index
    %2 = vector.load %arg1[%c1, %c0_3, %c0_4, %c0_5] : memref<2x1x4x128xbf16, #tpu.memory_space<vmem>>, vector<1x1x4x128xbf16>
    %3 = vector.shape_cast %2 : vector<1x1x4x128xbf16> to vector<4x128xbf16>
    %c0_6 = arith.constant 0 : index
    %c0_7 = arith.constant 0 : index
    %4 = vector.load %arg2[%c0_6, %c0_7] : memref<128x128xbf16, #tpu.memory_space<vmem>>, vector<128x128xbf16>
    %c0_8 = arith.constant 0 : index
    %c0_9 = arith.constant 0 : index
    %5 = vector.load %arg3[%c0_8, %c0_9] : memref<1x128xf32, #tpu.memory_space<vmem>>, vector<1x128xf32>
    %cst = arith.constant dense<0.000000e+00> : vector<4x128xf32>
    %6 = tpu.matmul %1, %4, %cst {dimension_numbers = #tpu.dot_dimension_numbers<[1], [0], [0], [1], [0, 0, 1, 1], [], []>} : vector<4x128xbf16>, vector<128x128xbf16>, vector<4x128xf32> -> vector<4x128xf32>
    %7 = vector.broadcast %5 : vector<1x128xf32> to vector<4x128xf32>
    %8 = arith.addf %6, %7 : vector<4x128xf32>
    %cst_10 = arith.constant dense<0.000000e+00> : vector<4x128xf32>
    %9 = tpu.matmul %3, %4, %cst_10 {dimension_numbers = #tpu.dot_dimension_numbers<[1], [0], [0], [1], [0, 0, 1, 1], [], []>} : vector<4x128xbf16>, vector<128x128xbf16>, vector<4x128xf32> -> vector<4x128xf32>
    %10 = vector.broadcast %5 : vector<1x128xf32> to vector<4x128xf32>
    %11 = arith.addf %9, %10 : vector<4x128xf32>
    %12 = arith.mulf %8, %11 : vector<4x128xf32>
    %13 = arith.negf %12 : vector<4x128xf32>
    %14 = math.exp %13 : vector<4x128xf32>
    %cst_11 = arith.constant 1.000000e+00 : f32
    %15 = vector.broadcast %cst_11 : f32 to vector<4x128xf32>
    %16 = arith.addf %15, %14 : vector<4x128xf32>
    %17 = arith.divf %15, %16 : vector<4x128xf32>
    %18 = arith.extf %1 : vector<4x128xbf16> to vector<4x128xf32>
    %19 = arith.mulf %8, %17 : vector<4x128xf32>
    %20 = arith.mulf %18, %19 : vector<4x128xf32>
    %21 = arith.extf %3 : vector<4x128xbf16> to vector<4x128xf32>
    %22 = arith.mulf %11, %17 : vector<4x128xf32>
    %23 = arith.mulf %21, %22 : vector<4x128xf32>
    %cst_12 = arith.constant dense<0.000000e+00> : vector<128xf32>
    %24 = vector.multi_reduction <add>, %20, %cst_12 [0] : vector<4x128xf32> to vector<128xf32>
    %25 = vector.shape_cast %24 : vector<128xf32> to vector<1x128xf32>
    %cst_13 = arith.constant 2.500000e-01 : f32
    %26 = vector.broadcast %cst_13 : f32 to vector<1x128xf32>
    %27 = arith.mulf %25, %26 : vector<1x128xf32>
    %cst_14 = arith.constant dense<0.000000e+00> : vector<128xf32>
    %28 = vector.multi_reduction <add>, %23, %cst_14 [0] : vector<4x128xf32> to vector<128xf32>
    %29 = vector.shape_cast %28 : vector<128xf32> to vector<1x128xf32>
    %cst_15 = arith.constant 2.500000e-01 : f32
    %30 = vector.broadcast %cst_15 : f32 to vector<1x128xf32>
    %31 = arith.mulf %29, %30 : vector<1x128xf32>
    %c0_16 = arith.constant 0 : index
    %c0_17 = arith.constant 0 : index
    %32 = vector.load %arg4[%c0_16, %c0_17] : memref<256x128xbf16, #tpu.memory_space<vmem>>, vector<256x128xbf16>
    %33 = arith.truncf %27 : vector<1x128xf32> to vector<1x128xbf16>
    %34 = vector.extract_strided_slice %32 {offsets = [0, 0], sizes = [128, 128], strides = [1, 1]} : vector<256x128xbf16> to vector<128x128xbf16>
    %cst_18 = arith.constant dense<0.000000e+00> : vector<1x128xf32>
    %35 = tpu.matmul %33, %34, %cst_18 {dimension_numbers = #tpu.dot_dimension_numbers<[1], [0], [0], [1], [0, 0, 1, 1], [], []>} : vector<1x128xbf16>, vector<128x128xbf16>, vector<1x128xf32> -> vector<1x128xf32>
    %36 = arith.truncf %31 : vector<1x128xf32> to vector<1x128xbf16>
    %37 = vector.extract_strided_slice %32 {offsets = [128, 0], sizes = [128, 128], strides = [1, 1]} : vector<256x128xbf16> to vector<128x128xbf16>
    %cst_19 = arith.constant dense<0.000000e+00> : vector<1x128xf32>
    %38 = tpu.matmul %36, %37, %cst_19 {dimension_numbers = #tpu.dot_dimension_numbers<[1], [0], [0], [1], [0, 0, 1, 1], [], []>} : vector<1x128xbf16>, vector<128x128xbf16>, vector<1x128xf32> -> vector<1x128xf32>
    %39 = arith.addf %35, %38 : vector<1x128xf32>
    %c0_20 = arith.constant 0 : index
    %c0_21 = arith.constant 0 : index
    %40 = vector.load %arg5[%c0_20, %c0_21] : memref<1x128xf32, #tpu.memory_space<vmem>>, vector<1x128xf32>
    %41 = arith.addf %39, %40 : vector<1x128xf32>
    %c0_22 = arith.constant 0 : index
    %c0_23 = arith.constant 0 : index
    %c0_24 = arith.constant 0 : index
    %42 = vector.load %arg6[%c0_22, %c0_23, %c0_24] : memref<1x1x128xf32, #tpu.memory_space<vmem>>, vector<1x1x128xf32>
    %43 = vector.shape_cast %42 : vector<1x1x128xf32> to vector<1x128xf32>
    %44 = vector.shape_cast %41 : vector<1x128xf32> to vector<1x1x128xf32>
    tpu.vector_store %arg6[%c0_22, %c0_23, %c0_24], %44 {strides = array<i32>} : memref<1x1x128xf32, #tpu.memory_space<vmem>>, vector<1x1x128xf32>,
    return
  }
  func.func @transform_0(%arg0: i32) -> (i32, i32, i32, i32) {
    %c0_i32 = arith.constant 0 : i32
    %c0_i32_0 = arith.constant 0 : i32
    %c0_i32_1 = arith.constant 0 : i32
    %c0_i32_2 = arith.constant 0 : i32
    return %c0_i32, %arg0, %c0_i32_0, %c0_i32_1 : i32, i32, i32, i32
  }
  func.func @transform_1(%arg0: i32) -> (i32, i32) {
    %c0_i32 = arith.constant 0 : i32
    %c0_i32_0 = arith.constant 0 : i32
    %c0_i32_1 = arith.constant 0 : i32
    return %c0_i32, %c0_i32_0 : i32, i32
  }
  func.func @transform_2(%arg0: i32) -> (i32, i32) {
    %c0_i32 = arith.constant 0 : i32
    %c0_i32_0 = arith.constant 0 : i32
    %c0_i32_1 = arith.constant 0 : i32
    return %c0_i32, %c0_i32_0 : i32, i32
  }
  func.func @transform_3(%arg0: i32) -> (i32, i32) {
    %c0_i32 = arith.constant 0 : i32
    %c0_i32_0 = arith.constant 0 : i32
    %c0_i32_1 = arith.constant 0 : i32
    return %c0_i32, %c0_i32_0 : i32, i32
  }
  func.func @transform_4(%arg0: i32) -> (i32, i32) {
    %c0_i32 = arith.constant 0 : i32
    %c0_i32_0 = arith.constant 0 : i32
    %c0_i32_1 = arith.constant 0 : i32
    return %c0_i32, %c0_i32_0 : i32, i32
  }
  func.func @transform_5(%arg0: i32) -> (i32, i32, i32) {
    %c0_i32 = arith.constant 0 : i32
    %c0_i32_0 = arith.constant 0 : i32
    %c0_i32_1 = arith.constant 0 : i32
    return %arg0, %c0_i32, %c0_i32_0 : i32, i32, i32
  }
}

</mosaic_0001>

<bundles_post_ra>
// kernel: forward.3
= control target key start
LH: loop header
LB: loop body
LE: loop exit
PB: predicated region body
PF: predicated region fallthrough
CT: control target
= control target key end

     0   :  { %10 = vsyncpa [#allocation4], 0  ;;  %s1286_s0 = inlined_call_operand.vmem [shape: bf16[2,2,4,128], index: 0, kind: input, shape index: {}]   ;;  %s1287_s1 = inlined_call_operand.vmem [shape: bf16[128,128], index: 1, kind: input, shape index: {}]   ;;  %s1288_s2 = inlined_call_operand.vmem [shape: f32[1,128], index: 2, kind: input, shape index: {}]   ;;  %s1289_s3 = inlined_call_operand.vmem [shape: bf16[256,128], index: 3, kind: input, shape index: {}]   ;;  %s1290_s4 = inlined_call_operand.vmem [shape: f32[1,128], index: 4, kind: input, shape index: {}]   ;;  %s1291_s5 = inlined_call_operand.hbm [shape: f32[2,1,128], index: 5, kind: output, shape index: {}]  }
   0x1   :  { %12 = vsyncpa [#allocation4 + $0x1], 0  ;;  %s1050_s18 = smov 0   ;;  %s1052_s19 = smov 0  }
   0x2   :  { %s1054_s20 = smov 0   ;;  %s1056_s21 = smov 0  }
   0x3 LB: > { %s730_s22 = sadd.s32 4294967295, %s1015_s21   ;;  %s731_s23 = sadd.s32 4294967294, %s1015_s21   ;;  %s1015_s21 = sphi %s1056_s21, %s1297_s21   ;;  %s1011_s20 = sphi %s1054_s20, %s1296_s20   ;;  %s1007_s19 = sphi %s1052_s19, %s1295_s19   ;;  %s1003_s18 = sphi %s1050_s18, %s1294_s18  }
   0x4   : > { %s1073_s24 = sadd.s32 1, %s1015_s21   ;;  %s25_s25 = sadd.s32 1, %s1011_s20 }
   0x5   : > { %s22_s26 = ssub.s32 %s1015_s21, %s1073_s24  ;;  %p32_p0 = scmp.ne.s32.totalorder %s1011_s20, %s1007_s19 }
   0x6   : > { %p23_p1 = scmp.eq.s32.totalorder %s22_s26, 0  ;;  %p33_p2 = scmp.eq.s32.totalorder %s1015_s21, 0 }
   0x7   : > { %p146_p3 = scmp.eq.s32.totalorder %s730_s22, 1  ;;  %p151_p4 = scmp.ne.s32.totalorder %s1007_s19, %s1003_s18 }
   0x8   : > { %s1086_s27 = scalar_select %p23_p1, %s1011_s20, %s25_s25  }
   0x9   : > { %p34_p5 = por %p33_p2, %p32_p0  ;;  %p1088_p6 = por %p146_p3, %p32_p0 }
   0xa   : > { %p152_p7 = scmp.eq.s32.totalorder %s731_s23, 1  ;;  %p733_p9 = scmp.ge.s32.totalorder %s1015_s21, 2 }
   0xc   : > { %p1092_p8 = por %p152_p7, %p151_p4  ;;  %180 = sbr.rel (%p733_p9) target bundleno = 26 (0x1a), region = 32 }
  0x13   : > { %183 = sbr.rel (!%p34_p5) target bundleno = 26 (0x1a), region = 36  ;;  %s185_s30 = sand.u32 (%p34_p5), 1, %s1011_s20  }
  0x14   : > { %s735_s6 = sshll.u32 (%p34_p5), %s1015_s21, 1  ;;  %s734_s7 = sshll.u32 (%p34_p5), %s185_s30, 2 }
  0x15   : > { %s189_s10 = scalar_lea.vmem (%p34_p5), %s1286_s0, %s735_s6  ;;  %s187_s11 = scalar_lea.vmem (%p34_p5), [#allocation2], %s734_s7 }
  0x16   : > { %v205_v0 = vld [vmem:[%s189_s10] sm:$0x3] (%p34_p5)  ;;  %v207_v1 = vld [vmem:[%s189_s10 + $0x4] sm:$0x3] (%p34_p5) }
  0x17   : > { %206 = vst [vmem:[%s187_s11] sm:$0x3] (%p34_p5), %v205_v0  ;;  %208 = vst [vmem:[%s187_s11 + $0x2] sm:$0x3] (%p34_p5), %v207_v1 }
  0x1a PF: > { %p736_p10 = scmp.ge.s32.totalorder %s1015_s21, 1  ;;  %p226_p11 = scmp.lt.s32.totalorder %s1015_s21, 3 }
  0x1c   : > { %p227_p12 = pnand %p736_p10, %p226_p11 }
  0x1d   : > { %v925_v2 = vld [vmem:[%s1287_s1] sm:$0xff] (!%p227_p12)   ;;  %v1017_v3 = vmov (!%p227_p12), 0.0   ;;  %v926_v4 = vld [vmem:[%s1287_s1 + $0x8] sm:$0xff] (!%p227_p12)   ;;  %vm1018_vm0 = vmmov (!%p227_p12), 0   ;;  %v927_v5 = vld [vmem:[%s1287_s1 + $0x10] sm:$0xff] (!%p227_p12)   ;;  %s1141_s8 = sand.u32 (!%p227_p12), 1, %s1007_s19  }
  0x1e   : > { %230 = sbr.rel (%p227_p12) target bundleno = 555 (0x22b), region = 70  ;;  %804 = vmatprep.subr.bf16.mxu0 (!%p227_p12), %v1017_v3  ;;  %824 = vmatprep.subr.bf16.mxu1 (!%p227_p12), %v1017_v3  ;;  %v928_v6 = vld [vmem:[%s1287_s1 + $0x18] sm:$0xff] (!%p227_p12)   ;;  %v929_v7 = vld [vmem:[%s1287_s1 + $0x20] sm:$0xff] (!%p227_p12)   ;;  %v930_v8 = vld [vmem:[%s1287_s1 + $0x28] sm:$0xff] (!%p227_p12)   ;;  %s737_s11 = sshll.u32 (!%p227_p12), %s1141_s8, 2  ;;  %vm427_vm1 = vcmask (!%p227_p12), 1043456  }
  0x1f   : > { %805 = vmatpush3.bf16.msra.mxu0 (!%p227_p12), %v925_v2  ;;  %825 = vmatpush3.bf16.msra.mxu1 (!%p227_p12), %v925_v2  ;;  %v931_v9 = vld [vmem:[%s1287_s1 + $0x30] sm:$0xff] (!%p227_p12)   ;;  %v932_v10 = vld [vmem:[%s1287_s1 + $0x38] sm:$0xff] (!%p227_p12)   ;;  %s235_s14 = scalar_lea.vmem (!%p227_p12), [#allocation2], %s737_s11  ;;  %v933_v13 = vld [vmem:[%s1289_s3 + $0x40] sm:$0xff] (!%p227_p12)   ;;  %s765_s30 = sshll.u32 (!%p227_p12), %s730_s22, 4 }
  0x20   : > { %806 = vmatprep.subr.bf16.mxu0 (!%p227_p12), %v1017_v3  ;;  %826 = vmatprep.subr.bf16.mxu1 (!%p227_p12), %v1017_v3  ;;  %v1154_v11 = vld [vmem:[%s235_s14] sm:$0x3] (!%p227_p12)  ;;  %v1156_v12 = vld [vmem:[%s235_s14 + $0x2] sm:$0x3] (!%p227_p12)  ;;  %v935_v15 = vld [vmem:[%s1289_s3 + $0x48] sm:$0xff] (!%p227_p12)   ;;  %s258_s6 = scalar_lea.vmem (!%p227_p12), [#allocation3], %s1141_s8  ;;  %s1242_s11 = scalar_lea.hbm (!%p227_p12), %s1291_s5, %s765_s30 }
  0x21   : > { %820 = vmatprep.mubr.msk.bf16.mxu0 (!%p227_p12), %vm1018_vm0, %v1017_v3  ;;  %840 = vmatprep.mubr.msk.bf16.mxu1 (!%p227_p12), %vm1018_vm0, %v1017_v3  ;;  %v934_v14 = vld [vmem:[%s1289_s3] sm:$0xff] (!%p227_p12)   ;;  %v936_v16 = vld [vmem:[%s1289_s3 + $0x8] sm:$0xff] (!%p227_p12)   ;;  %v937_v17 = vld [vmem:[%s1289_s3 + $0x50] sm:$0xff] (!%p227_p12)   ;;  %v421_v44 = vunpack.c.l.bf16 (!%p227_p12), %v1154_v11  ;;  %v424_v45 = vunpack.c.l.bf16 (!%p227_p12), %v1156_v12  ;;  %s670_s7 = sshll.u32 (!%p227_p12), %s258_s6, 4  ;;  %s658_s22 = scalar_lea.sflag (!%p227_p12), [#allocation4], %s1141_s8  ;;  %s1244_s7 = int_to_ptr.vmem [resolvable:$true] %s670_s7 }
  0x22   : > { %v938_v18 = vld [vmem:[%s1289_s3 + $0x10] sm:$0xff] (!%p227_p12)   ;;  %v939_v19 = vld [vmem:[%s1289_s3 + $0x58] sm:$0xff] (!%p227_p12)   ;;  %v941_v21 = vld [vmem:[%s1289_s3 + $0x60] sm:$0xff] (!%p227_p12)   ;;  %s953_s12 = scalar_lea.vmem (!%p227_p12), %s1244_s7, 16  ;;  %s1019_s13 = smov (!%p227_p12), [#allocation3]  }
  0x23   : > { %807 = vmatpush3.bf16.msra.mxu0 (!%p227_p12), %v926_v4  ;;  %827 = vmatpush3.bf16.msra.mxu1 (!%p227_p12), %v926_v4  ;;  %v940_v20 = vld [vmem:[%s1289_s3 + $0x18] sm:$0xff] (!%p227_p12)   ;;  %v942_v22 = vld [vmem:[%s1289_s3 + $0x20] sm:$0xff] (!%p227_p12)   ;;  %v943_v23 = vld [vmem:[%s1289_s3 + $0x68] sm:$0xff] (!%p227_p12)   ;;  %p954_p13 = scmp.ne.s32.totalorder (!%p227_p12), %s1244_s7, %s953_s12  ;;  %s957_s14 = sshll.u32 (!%p227_p12), %s1019_s13, 4  ;;  %s958_s14 = int_to_ptr.vmem [resolvable:$false] %s957_s14 }
  0x24   : > { %808 = vmatprep.subr.bf16.mxu0 (!%p227_p12), %v1017_v3  ;;  %828 = vmatprep.subr.bf16.mxu1 (!%p227_p12), %v1017_v3  ;;  %v944_v24 = vld [vmem:[%s1289_s3 + $0x28] sm:$0xff] (!%p227_p12)   ;;  %v945_v25 = vld [vmem:[%s1289_s3 + $0x70] sm:$0xff] (!%p227_p12)   ;;  %v947_v27 = vld [vmem:[%s1289_s3 + $0x78] sm:$0xff] (!%p227_p12)   ;;  %s959_s15 = scalar_lea.vmem (!%p227_p12), %s958_s14, 32  ;;  %p960_p2 = scmp.lt.s32.totalorder (!%p227_p12), %s1244_s7, %s958_s14 }
  0x25   : > { %v946_v26 = vld [vmem:[%s1289_s3 + $0x30] sm:$0xff]   ;;  %v948_v28 = vld [vmem:[%s1289_s3 + $0x38] sm:$0xff]   ;;  %v739_v29 = vld [vmem:[%s1288_s2] ss:$0 sm:$0xff]  ;;  %p955_p0 = pnand %p954_p13, %p1088_p6  ;;  %p961_p3 = scmp.lt.s32.totalorder %s959_s15, %s953_s12 }
  0x27   : > { %809 = vmatpush3.bf16.msra.mxu0 %v927_v5  ;;  %829 = vmatpush3.bf16.msra.mxu1 %v927_v5  ;;  %p956_p1 = pneg %p955_p0  ;;  %p962_p4 = por %p961_p3, %p960_p2 }
  0x28   : > { %810 = vmatprep.subr.bf16.mxu0 %v1017_v3  ;;  %830 = vmatprep.subr.bf16.mxu1 %v1017_v3 }
  0x29   : > { %p963_p5 = pnand %p962_p4, %p956_p1 }
  0x2b   : > { %811 = vmatpush3.bf16.msra.mxu0 %v928_v6  ;;  %831 = vmatpush3.bf16.msra.mxu1 %v928_v6 }
  0x2c   : > { %812 = vmatprep.subr.bf16.mxu0 %v1017_v3  ;;  %832 = vmatprep.subr.bf16.mxu1 %v1017_v3 }
  0x2f   : > { %813 = vmatpush3.bf16.msra.mxu0 %v929_v7  ;;  %833 = vmatpush3.bf16.msra.mxu1 %v929_v7  ;;  %v654_v7 = vld [vmem:[%s1290_s4] sm:$0x1] }
  0x30   : > { %814 = vmatprep.subr.bf16.mxu0 %v1017_v3  ;;  %834 = vmatprep.subr.bf16.mxu1 %v1017_v3 }
  0x33   : > { %815 = vmatpush3.bf16.msra.mxu0 %v930_v8  ;;  %835 = vmatpush3.bf16.msra.mxu1 %v930_v8 }
  0x34   : > { %816 = vmatprep.subr.bf16.mxu0 %v1017_v3  ;;  %836 = vmatprep.subr.bf16.mxu1 %v1017_v3 }
  0x37   : > { %817 = vmatpush3.bf16.msra.mxu0 %v931_v9  ;;  %837 = vmatpush3.bf16.msra.mxu1 %v931_v9 }
  0x38   : > { %818 = vmatprep.subr.bf16.mxu0 %v1017_v3  ;;  %838 = vmatprep.subr.bf16.mxu1 %v1017_v3 }
  0x3b   : > { %819 = vmatpush3.bf16.msra.mxu0 %v932_v10  ;;  %839 = vmatpush3.bf16.msra.mxu1 %v932_v10 }
  0x3c   : > { %844 = vmatprep.subr.bf16.mxu0 %v1017_v3  ;;  %864 = vmatprep.subr.bf16.mxu1 %v1017_v3 }
  0x3e   : > { %821 = vmatmul.mubr.bf16.vlgmr.msra.gmra.mrb[0].mxu0 %v1154_v11  ;;  %841 = vmatmul.mubr.bf16.vlgmr.msra.gmra.mrb[0].mxu1 %v1156_v12 }
  0x3f   : > { %860 = vmatprep.mubr.msk.bf16.mxu0 %vm1018_vm0, %v1017_v3  ;;  %880 = vmatprep.mubr.msk.bf16.mxu1 %vm1018_vm0, %v1017_v3 }
  0x40   : > { %845 = vmatpush3.bf16.msra.mxu0 %v933_v13  ;;  %865 = vmatpush3.bf16.msra.mxu1 %v934_v14 }
  0x41   : > { %846 = vmatprep.subr.bf16.mxu0 %v1017_v3  ;;  %866 = vmatprep.subr.bf16.mxu1 %v1017_v3 }
  0x44   : > { %847 = vmatpush3.bf16.msra.mxu0 %v935_v15  ;;  %867 = vmatpush3.bf16.msra.mxu1 %v936_v16 }
  0x45   : > { %848 = vmatprep.subr.bf16.mxu0 %v1017_v3  ;;  %868 = vmatprep.subr.bf16.mxu1 %v1017_v3 }
  0x48   : > { %849 = vmatpush3.bf16.msra.mxu0 %v937_v17  ;;  %869 = vmatpush3.bf16.msra.mxu1 %v938_v18 }
  0x49   : > { %850 = vmatprep.subr.bf16.mxu0 %v1017_v3  ;;  %870 = vmatprep.subr.bf16.mxu1 %v1017_v3 }
  0x4c   : > { %851 = vmatpush3.bf16.msra.mxu0 %v939_v19  ;;  %871 = vmatpush3.bf16.msra.mxu1 %v940_v20 }
  0x4d   : > { %852 = vmatprep.subr.bf16.mxu0 %v1017_v3  ;;  %872 = vmatprep.subr.bf16.mxu1 %v1017_v3 }
  0x50   : > { %853 = vmatpush3.bf16.msra.mxu0 %v941_v21  ;;  %873 = vmatpush3.bf16.msra.mxu1 %v942_v22 }
  0x51   : > { %854 = vmatprep.subr.bf16.mxu0 %v1017_v3  ;;  %874 = vmatprep.subr.bf16.mxu1 %v1017_v3 }
  0x54   : > { %855 = vmatpush3.bf16.msra.mxu0 %v943_v23  ;;  %875 = vmatpush3.bf16.msra.mxu1 %v944_v24 }
  0x55   : > { %856 = vmatprep.subr.bf16.mxu0 %v1017_v3  ;;  %876 = vmatprep.subr.bf16.mxu1 %v1017_v3 }
  0x58   : > { %857 = vmatpush3.bf16.msra.mxu0 %v945_v25  ;;  %877 = vmatpush3.bf16.msra.mxu1 %v946_v26 }
  0x59   : > { %858 = vmatprep.subr.bf16.mxu0 %v1017_v3  ;;  %878 = vmatprep.subr.bf16.mxu1 %v1017_v3 }
  0x5c   : > { %859 = vmatpush3.bf16.msra.mxu0 %v947_v27  ;;  %879 = vmatpush3.bf16.msra.mxu1 %v948_v28 }
 0x111   : > { %v368_v30 = vpop.f32.mrb[0].mxu0  ;;  %v408_v31 = vpop.f32.mrb[0].mxu1 }
 0x112   : > { %v369_v32 = vadd.f32 %v739_v29, %v368_v30  ;;  %v409_v33 = vadd.f32 %v739_v29, %v408_v31  ;;  %v822_v34 = vpop.f32.mrb[1].mxu0  ;;  %v842_v35 = vpop.f32.mrb[1].mxu1 }
 0x113   : > { %v371_v36 = vpop.f32.mrb[2].mxu0  ;;  %v411_v37 = vpop.f32.mrb[2].mxu1 }
 0x114   : > { %v414_v38 = vmul.f32 %v409_v33, %v369_v32  ;;  %v823_v39 = vpop.f32.mrb[3].mxu0  ;;  %v843_v40 = vpop.f32.mrb[3].mxu1 }
 0x116   : > { %v748_v41 = vmul.f32 -1.442695, %v414_v38 }
 0x118   : > { %949 = vpow2.f32 %v748_v41 }
 0x122   : > { %v950_v42 = vpop.eup %949 }
 0x123   : > { %v418_v43 = vadd.f32 1.0, %v950_v42 }
 0x125   : > { %951 = vrcp.f32 %v418_v43 }
 0x12f   : > { %v952_v46 = vpop.eup %951 }
 0x130   : > { %v422_v47 = vmul.f32 %v952_v46, %v369_v32  ;;  %v425_v48 = vmul.f32 %v952_v46, %v409_v33 }
 0x132   : > { %v423_v49 = vmul.f32 %v422_v47, %v421_v44  ;;  %v426_v50 = vmul.f32 %v425_v48, %v424_v45 }
 0x134   : > { %v428_v51 = vsel %vm427_vm1, %v423_v49, 0.0  ;;  %v436_v52 = vsel %vm427_vm1, %v426_v50, 0.0 }
 0x135   : > { %v429_v53 = vrot.slane %v428_v51, 4  ;;  %v437_v54 = vrot.slane %v436_v52, 4 }
 0x137   : > { %v430_v55 = vadd.f32 %v429_v53, %v428_v51  ;;  %v438_v56 = vadd.f32 %v437_v54, %v436_v52 }
 0x139   : > { %v431_v57 = vrot.slane %v430_v55, 2  ;;  %v439_v58 = vrot.slane %v438_v56, 2 }
 0x13b   : > { %v440_v59 = vadd.f32 %v439_v58, %v438_v56  ;;  %v432_v60 = vadd.f32 %v431_v57, %v430_v55 }
 0x13d   : > { %v441_v61 = vrot.slane %v440_v59, 1  ;;  %v433_v62 = vrot.slane %v432_v60, 1 }
 0x13f   : > { %v442_v63 = vadd.f32 %v441_v61, %v440_v59  ;;  %v434_v0 = vadd.f32 %v433_v62, %v432_v60 }
 0x141   : > { %v443_v1 = vmul.f32 0.25, %v442_v63  ;;  %v435_v2 = vmul.f32 0.25, %v434_v0 }
 0x143   : > { %v477_v3 = vpack.c.bf16 %v443_v1, %v443_v1  ;;  %v476_v4 = vpack.c.bf16 %v435_v2, %v435_v2 }
 0x145   : > { %861 = vmatmul.mubr.bf16.vlgmr.msra.gmra.mrb[4].mxu0 %v477_v3  ;;  %881 = vmatmul.mubr.bf16.vlgmr.msra.gmra.mrb[4].mxu1 %v476_v4 }
 0x218   : > { %v560_v5 = vpop.f32.mrb[4].mxu0  ;;  %v648_v6 = vpop.f32.mrb[4].mxu1 }
 0x219   : > { %v649_v8 = vadd.f32 %v648_v6, %v560_v5  ;;  %v862_v9 = vpop.f32.mrb[5].mxu0  ;;  %v882_v10 = vpop.f32.mrb[5].mxu1 }
 0x21a   : > { %v563_v11 = vpop.f32.mrb[6].mxu0  ;;  %v651_v12 = vpop.f32.mrb[6].mxu1 }
 0x21b   : > { %v655_v13 = vadd.f32 %v654_v7, %v649_v8  ;;  %v863_v14 = vpop.f32.mrb[7].mxu0  ;;  %v883_v15 = vpop.f32.mrb[7].mxu1 }
 0x21d   : > { %656 = vst [vmem:[%s258_s6] sm:$0x1] %v655_v13 }
 0x21e   : > { %966 = shalt.err (!%p963_p5)
}
 0x21f   : > { %s967_s8 = scalar_lea.hbm %s1242_s11, 16  ;;  %s971_s23 = scalar_lea.hbm %s1291_s5, 32 }
 0x220   : > { %p968_p7 = scmp.ne.s32.totalorder %s1242_s11, %s967_s8  ;;  %p972_p12 = scmp.lt.u32.totalorder %s1242_s11, %s1291_s5 }
 0x221   : > { %p973_p13 = scmp.lt.u32.totalorder %s971_s23, %s967_s8  ;;  %p975_p1 = scmp.lt.u32.totalorder %s967_s8, %s1242_s11 }
 0x222   : > { %p969_p10 = pnand %p968_p7, %p1088_p6 }
 0x223   : > { %p974_p0 = por %p973_p13, %p972_p12 }
 0x224   : > { %p970_p11 = pneg %p969_p10 }
 0x225   : > { %p976_p2 = por %p975_p1, %p974_p0 }
 0x227   : > { %p977_p3 = pnand %p976_p2, %p970_p11 }
 0x229   : > { %980 = shalt.err (!%p977_p3)
}
 0x22a   : > { %884 = dma.vmem_to_hbm [thread:$0]  (%p1088_p6), %s1244_s7, 16, %s1242_s11, %s658_s22  }
 0x22b PF: > { %s682_s30 = sand.u32 1, %s1003_s18   ;;  %p887_p4 = pnand %p733_p9, %p1092_p8 }
 0x22c   : > { %s683_s6 = scalar_lea.sflag [#allocation4], %s682_s30 }
 0x22d   : > { %998 = dma.done.wait (!%p887_p4), %s683_s6, 16  }
 0x22e   : > { %1000 = vsyncadd (!%p887_p4), %s683_s6, 4294967280  ;;  %p15_p5 = scmp.ge.s32.totalorder %s1073_s24, 4   ;;  %s1294_s18 = smov %s1007_s19 }
 0x22f   : > { %s1295_s19 = smov %s1011_s20  ;;  %s1296_s20 = smov %s1086_s27 }
 0x230   : > { %s1297_s21 = smov %s1073_s24  ;;  %17 = sbr.rel (!%p15_p5) target bundleno = 3 (0x3), region = 115 }
 0x237   :  { %687 = vsyncpa [#allocation4], 1 }
 0x238   :  { %689 = vsyncpa [#allocation4 + $0x1], 1 }

// kernel: forward.2
= control target key start
LH: loop header
LB: loop body
LE: loop exit
PB: predicated region body
PF: predicated region fallthrough
CT: control target
= control target key end

     0   :  { %s3566_s1 = inlined_call_operand.vmem [shape: bf16[3072,128], index: 1, kind: input, shape index: {}]   ;;  %s3567_s0 = inlined_call_operand.vmem [shape: bf16[16,3072], index: 0, kind: input, shape index: {}]   ;;  %s3568_s2 = inlined_call_operand.vmem [shape: f32[1,128], index: 2, kind: input, shape index: {}]   ;;  %s3569_s3 = inlined_call_operand.vmem [shape: bf16[16,128], index: 3, kind: output, shape index: {}]  }
   0x1   :  { %v2700_v0 = vld [vmem:[%s3566_s1 + $0x40] sm:$0xff]   ;;  %v2704_v4 = vld [vmem:[%s3566_s1 + $0x48] sm:$0xff]   ;;  %v2708_v8 = vld [vmem:[%s3566_s1 + $0x50] sm:$0xff]  }
   0x2   :  { %v2701_v1 = vld [vmem:[%s3566_s1 + $0xc0] sm:$0xff]   ;;  %2436 = vmatprep.subr.bf16.mxu0 %v2700_v0  ;;  %v2705_v5 = vld [vmem:[%s3566_s1 + $0xc8] sm:$0xff]   ;;  %v2709_v9 = vld [vmem:[%s3566_s1 + $0xd0] sm:$0xff]  }
   0x3   :  { %v2702_v2 = vld [vmem:[%s3566_s1] sm:$0xff]   ;;  %2458 = vmatprep.subr.bf16.mxu1 %v2701_v1  ;;  %v2706_v6 = vld [vmem:[%s3566_s1 + $0x8] sm:$0xff]   ;;  %v2710_v10 = vld [vmem:[%s3566_s1 + $0x10] sm:$0xff]  }
   0x4   :  { %v2703_v3 = vld [vmem:[%s3566_s1 + $0x80] sm:$0xff]   ;;  %2437 = vmatpush3.bf16.msra.mxu0 %v2702_v2  ;;  %v2707_v7 = vld [vmem:[%s3566_s1 + $0x88] sm:$0xff]   ;;  %v2711_v11 = vld [vmem:[%s3566_s1 + $0x90] sm:$0xff]  }
   0x5   :  { %2459 = vmatpush3.bf16.msra.mxu1 %v2703_v3  ;;  %2438 = vmatprep.subr.bf16.mxu0 %v2704_v4  ;;  %v2712_v12 = vld [vmem:[%s3566_s1 + $0x58] sm:$0xff]   ;;  %v2716_v16 = vld [vmem:[%s3566_s1 + $0x60] sm:$0xff]   ;;  %v2720_v20 = vld [vmem:[%s3566_s1 + $0x68] sm:$0xff]  }
   0x6   :  { %2460 = vmatprep.subr.bf16.mxu1 %v2705_v5  ;;  %v2713_v13 = vld [vmem:[%s3566_s1 + $0xd8] sm:$0xff]   ;;  %v2717_v17 = vld [vmem:[%s3566_s1 + $0xe0] sm:$0xff]   ;;  %v2721_v21 = vld [vmem:[%s3566_s1 + $0xe8] sm:$0xff]  }
   0x7   :  { %v2714_v14 = vld [vmem:[%s3566_s1 + $0x18] sm:$0xff]   ;;  %v2718_v18 = vld [vmem:[%s3566_s1 + $0x20] sm:$0xff]   ;;  %v2722_v22 = vld [vmem:[%s3566_s1 + $0x28] sm:$0xff]  }
   0x8   :  { %2439 = vmatpush3.bf16.msra.mxu0 %v2706_v6  ;;  %v2715_v15 = vld [vmem:[%s3566_s1 + $0x98] sm:$0xff]   ;;  %v2719_v19 = vld [vmem:[%s3566_s1 + $0xa0] sm:$0xff]   ;;  %v2723_v23 = vld [vmem:[%s3566_s1 + $0xa8] sm:$0xff]  }
   0x9   :  { %2461 = vmatpush3.bf16.msra.mxu1 %v2707_v7  ;;  %2440 = vmatprep.subr.bf16.mxu0 %v2708_v8  ;;  %v2724_v24 = vld [vmem:[%s3566_s1 + $0x70] sm:$0xff]   ;;  %v2728_v28 = vld [vmem:[%s3566_s1 + $0x78] sm:$0xff]   ;;  %v15_v32 = vld [vmem:[%s3567_s0] sm:$0xff] }
   0xa   :  { %2462 = vmatprep.subr.bf16.mxu1 %v2709_v9  ;;  %v2725_v25 = vld [vmem:[%s3566_s1 + $0xf0] sm:$0xff]   ;;  %v2729_v29 = vld [vmem:[%s3566_s1 + $0xf8] sm:$0xff]   ;;  %v27_v33 = vld [vmem:[%s3567_s0 + $0x60] sm:$0xff] }
   0xb   :  { %v2726_v26 = vld [vmem:[%s3566_s1 + $0x30] sm:$0xff]   ;;  %v2730_v30 = vld [vmem:[%s3566_s1 + $0x38] sm:$0xff]   ;;  %v16_v34 = vld [vmem:[%s3567_s0 + $0x8] sm:$0xff]  ;;  %v2211_v35 = vcombine.low %v15_v32, %v27_v33  ;;  %v2212_v36 = vcombine.high %v15_v32, %v27_v33 }
   0xc   :  { %2441 = vmatpush3.bf16.msra.mxu0 %v2710_v10  ;;  %v2727_v27 = vld [vmem:[%s3566_s1 + $0xb0] sm:$0xff]   ;;  %v2731_v31 = vld [vmem:[%s3566_s1 + $0xb8] sm:$0xff]   ;;  %v28_v37 = vld [vmem:[%s3567_s0 + $0x68] sm:$0xff] }
   0xd   :  { %2463 = vmatpush3.bf16.msra.mxu1 %v2711_v11  ;;  %2442 = vmatprep.subr.bf16.mxu0 %v2712_v12  ;;  %v2213_v38 = vcombine.low %v16_v34, %v28_v37  ;;  %v2214_v39 = vcombine.high %v16_v34, %v28_v37  ;;  %v2732_v40 = vld [vmem:[%s3566_s1 + $0x140] sm:$0xff]   ;;  %v2736_v44 = vld [vmem:[%s3566_s1 + $0x148] sm:$0xff]   ;;  %v2740_v48 = vld [vmem:[%s3566_s1 + $0x150] sm:$0xff]  }
   0xe   :  { %2464 = vmatprep.subr.bf16.mxu1 %v2713_v13  ;;  %1734 = vmatprep.mubr.bf16.mxu0 %v2212_v36  ;;  %v2733_v41 = vld [vmem:[%s3566_s1 + $0x1c0] sm:$0xff]   ;;  %v2737_v45 = vld [vmem:[%s3566_s1 + $0x1c8] sm:$0xff]   ;;  %v2741_v49 = vld [vmem:[%s3566_s1 + $0x1d0] sm:$0xff]  }
   0xf   :  { %1775 = vmatprep.mubr.bf16.mxu1 %v2214_v39  ;;  %v2734_v42 = vld [vmem:[%s3566_s1 + $0x100] sm:$0xff]   ;;  %v2738_v46 = vld [vmem:[%s3566_s1 + $0x108] sm:$0xff]   ;;  %v2742_v50 = vld [vmem:[%s3566_s1 + $0x110] sm:$0xff]  }
  0x10   :  { %2443 = vmatpush3.bf16.msra.mxu0 %v2714_v14  ;;  %v2735_v43 = vld [vmem:[%s3566_s1 + $0x180] sm:$0xff]   ;;  %v2739_v47 = vld [vmem:[%s3566_s1 + $0x188] sm:$0xff]   ;;  %v2743_v51 = vld [vmem:[%s3566_s1 + $0x190] sm:$0xff]  }
  0x11   :  { %2465 = vmatpush3.bf16.msra.mxu1 %v2715_v15  ;;  %2444 = vmatprep.subr.bf16.mxu0 %v2716_v16  ;;  %v2744_v52 = vld [vmem:[%s3566_s1 + $0x158] sm:$0xff]   ;;  %v2748_v56 = vld [vmem:[%s3566_s1 + $0x160] sm:$0xff]   ;;  %v2752_v60 = vld [vmem:[%s3566_s1 + $0x168] sm:$0xff]  }
  0x12   :  { %2466 = vmatprep.subr.bf16.mxu1 %v2717_v17  ;;  %v2745_v53 = vld [vmem:[%s3566_s1 + $0x1d8] sm:$0xff]   ;;  %v2749_v57 = vld [vmem:[%s3566_s1 + $0x1e0] sm:$0xff]   ;;  %v2753_v61 = vld [vmem:[%s3566_s1 + $0x1e8] sm:$0xff]  }
  0x13   :  { %v2746_v54 = vld [vmem:[%s3566_s1 + $0x118] sm:$0xff]   ;;  %v2750_v58 = vld [vmem:[%s3566_s1 + $0x120] sm:$0xff]   ;;  %v2754_v62 = vld [vmem:[%s3566_s1 + $0x128] sm:$0xff]  }
  0x14   :  { %2445 = vmatpush3.bf16.msra.mxu0 %v2718_v18  ;;  %v2747_v55 = vld [vmem:[%s3566_s1 + $0x198] sm:$0xff]   ;;  %v2751_v59 = vld [vmem:[%s3566_s1 + $0x1a0] sm:$0xff]   ;;  %v2755_v63 = vld [vmem:[%s3566_s1 + $0x1a8] sm:$0xff]  }
  0x15   :  { %2467 = vmatpush3.bf16.msra.mxu1 %v2719_v19  ;;  %2446 = vmatprep.subr.bf16.mxu0 %v2720_v20  ;;  %v2756_v0 = vld [vmem:[%s3566_s1 + $0x170] sm:$0xff]   ;;  %v2760_v4 = vld [vmem:[%s3566_s1 + $0x178] sm:$0xff]   ;;  %v2764_v16 = vld [vmem:[%s3566_s1 + $0x240] sm:$0xff]  }
  0x16   :  { %2468 = vmatprep.subr.bf16.mxu1 %v2721_v21  ;;  %v2757_v1 = vld [vmem:[%s3566_s1 + $0x1f0] sm:$0xff]   ;;  %v2761_v5 = vld [vmem:[%s3566_s1 + $0x1f8] sm:$0xff]   ;;  %v2765_v17 = vld [vmem:[%s3566_s1 + $0x2c0] sm:$0xff]  }
  0x17   :  { %v2758_v2 = vld [vmem:[%s3566_s1 + $0x130] sm:$0xff]   ;;  %v2762_v6 = vld [vmem:[%s3566_s1 + $0x138] sm:$0xff]   ;;  %v2766_v18 = vld [vmem:[%s3566_s1 + $0x200] sm:$0xff]  }
  0x18   :  { %2447 = vmatpush3.bf16.msra.mxu0 %v2722_v22  ;;  %v2759_v3 = vld [vmem:[%s3566_s1 + $0x1b0] sm:$0xff]   ;;  %v2763_v7 = vld [vmem:[%s3566_s1 + $0x1b8] sm:$0xff]   ;;  %v2767_v19 = vld [vmem:[%s3566_s1 + $0x280] sm:$0xff]  }
  0x19   :  { %2469 = vmatpush3.bf16.msra.mxu1 %v2723_v23  ;;  %2448 = vmatprep.subr.bf16.mxu0 %v2724_v24  ;;  %v17_v8 = vld [vmem:[%s3567_s0 + $0x10] sm:$0xff]  ;;  %v18_v12 = vld [vmem:[%s3567_s0 + $0x18] sm:$0xff]  ;;  %v2768_v20 = vld [vmem:[%s3566_s1 + $0x248] sm:$0xff]  }
  0x1a   :  { %2470 = vmatprep.subr.bf16.mxu1 %v2725_v25  ;;  %v29_v9 = vld [vmem:[%s3567_s0 + $0x70] sm:$0xff]  ;;  %v30_v13 = vld [vmem:[%s3567_s0 + $0x78] sm:$0xff]  ;;  %v2769_v21 = vld [vmem:[%s3566_s1 + $0x2c8] sm:$0xff]  }
  0x1b   :  { %v2215_v10 = vcombine.low %v17_v8, %v29_v9  ;;  %v2216_v11 = vcombine.high %v17_v8, %v29_v9  ;;  %v2217_v14 = vcombine.low %v18_v12, %v30_v13  ;;  %v2218_v15 = vcombine.high %v18_v12, %v30_v13  ;;  %v2770_v22 = vld [vmem:[%s3566_s1 + $0x208] sm:$0xff]   ;;  %v2772_v24 = vld [vmem:[%s3566_s1 + $0x250] sm:$0xff]   ;;  %v2780_v32 = vld [vmem:[%s3566_s1 + $0x260] sm:$0xff]  }
  0x1c   :  { %2449 = vmatpush3.bf16.msra.mxu0 %v2726_v26  ;;  %v2771_v23 = vld [vmem:[%s3566_s1 + $0x288] sm:$0xff]   ;;  %v2773_v25 = vld [vmem:[%s3566_s1 + $0x2d0] sm:$0xff]   ;;  %v2781_v33 = vld [vmem:[%s3566_s1 + $0x2e0] sm:$0xff]  }
  0x1d   :  { %2471 = vmatpush3.bf16.msra.mxu1 %v2727_v27  ;;  %2450 = vmatprep.subr.bf16.mxu0 %v2728_v28  ;;  %v2774_v26 = vld [vmem:[%s3566_s1 + $0x210] sm:$0xff]   ;;  %v2776_v28 = vld [vmem:[%s3566_s1 + $0x258] sm:$0xff]   ;;  %v2782_v34 = vld [vmem:[%s3566_s1 + $0x220] sm:$0xff]  }
  0x1e   :  { %2472 = vmatprep.subr.bf16.mxu1 %v2729_v29  ;;  %v2775_v27 = vld [vmem:[%s3566_s1 + $0x290] sm:$0xff]   ;;  %v2777_v29 = vld [vmem:[%s3566_s1 + $0x2d8] sm:$0xff]   ;;  %v2784_v36 = vld [vmem:[%s3566_s1 + $0x268] sm:$0xff]  }
  0x1f   :  { %v2785_v37 = vld [vmem:[%s3566_s1 + $0x2e8] sm:$0xff]   ;;  %v2812_v8 = vld [vmem:[%s3566_s1 + $0x360] sm:$0xff]  }
  0x20   :  { %2451 = vmatpush3.bf16.msra.mxu0 %v2730_v30  ;;  %v2778_v30 = vld [vmem:[%s3566_s1 + $0x218] sm:$0xff]   ;;  %v2787_v39 = vld [vmem:[%s3566_s1 + $0x2a8] sm:$0xff]   ;;  %v2813_v9 = vld [vmem:[%s3566_s1 + $0x3e0] sm:$0xff]  }
  0x21   :  { %2473 = vmatpush3.bf16.msra.mxu1 %v2731_v31  ;;  %2480 = vmatprep.subr.bf16.mxu0 %v2732_v40  ;;  %v2779_v31 = vld [vmem:[%s3566_s1 + $0x298] sm:$0xff]   ;;  %v2788_v40 = vld [vmem:[%s3566_s1 + $0x270] sm:$0xff]   ;;  %v2816_v12 = vld [vmem:[%s3566_s1 + $0x368] sm:$0xff]  }
  0x22   :  { %2502 = vmatprep.subr.bf16.mxu1 %v2733_v41  ;;  %v2789_v41 = vld [vmem:[%s3566_s1 + $0x2f0] sm:$0xff]   ;;  %v2817_v13 = vld [vmem:[%s3566_s1 + $0x3e8] sm:$0xff]  }
  0x23   :  { %1735 = vmatmul.mubr.bf16.vlgmr.msra.gmra.mrb[0].mxu0 %v2211_v35  ;;  %v2783_v35 = vld [vmem:[%s3566_s1 + $0x2a0] sm:$0xff]  }
  0x24   :  { %1776 = vmatmul.mubr.bf16.vlgmr.msra.gmra.mrb[0].mxu1 %v2213_v38  ;;  %2481 = vmatpush3.bf16.msra.mxu0 %v2734_v42  ;;  %v2786_v38 = vld [vmem:[%s3566_s1 + $0x228] sm:$0xff]   ;;  %v2790_v42 = vld [vmem:[%s3566_s1 + $0x230] sm:$0xff]  }
  0x25   :  { %2503 = vmatpush3.bf16.msra.mxu1 %v2735_v43  ;;  %2482 = vmatprep.subr.bf16.mxu0 %v2736_v44  ;;  %v2791_v43 = vld [vmem:[%s3566_s1 + $0x2b0] sm:$0xff]   ;;  %v2792_v44 = vld [vmem:[%s3566_s1 + $0x278] sm:$0xff]  }
  0x26   :  { %2504 = vmatprep.subr.bf16.mxu1 %v2737_v45  ;;  %1816 = vmatprep.mubr.bf16.mxu0 %v2216_v11  ;;  %v2793_v45 = vld [vmem:[%s3566_s1 + $0x2f8] sm:$0xff]   ;;  %v2815_v11 = vld [vmem:[%s3566_s1 + $0x3a0] sm:$0xff]  }
  0x27   :  { %1857 = vmatprep.mubr.bf16.mxu1 %v2218_v15  ;;  %v2819_v15 = vld [vmem:[%s3566_s1 + $0x3a8] sm:$0xff]  }
  0x28   :  { %2483 = vmatpush3.bf16.msra.mxu0 %v2738_v46  ;;  %v2794_v46 = vld [vmem:[%s3566_s1 + $0x238] sm:$0xff]  }
  0x29   :  { %2505 = vmatpush3.bf16.msra.mxu1 %v2739_v47  ;;  %2484 = vmatprep.subr.bf16.mxu0 %v2740_v48  ;;  %v2795_v47 = vld [vmem:[%s3566_s1 + $0x2b8] sm:$0xff]   ;;  %v19_v48 = vld [vmem:[%s3567_s0 + $0x20] sm:$0xff] }
  0x2a   :  { %2506 = vmatprep.subr.bf16.mxu1 %v2741_v49  ;;  %v31_v49 = vld [vmem:[%s3567_s0 + $0x80] sm:$0xff] }
  0x2c   :  { %2485 = vmatpush3.bf16.msra.mxu0 %v2742_v50  ;;  %v20_v50 = vld [vmem:[%s3567_s0 + $0x28] sm:$0xff] }
  0x2d   :  { %2507 = vmatpush3.bf16.msra.mxu1 %v2743_v51  ;;  %2486 = vmatprep.subr.bf16.mxu0 %v2744_v52  ;;  %v32_v51 = vld [vmem:[%s3567_s0 + $0x88] sm:$0xff]  ;;  %v2219_v52 = vcombine.low %v19_v48, %v31_v49 }
  0x2e   :  { %2508 = vmatprep.subr.bf16.mxu1 %v2745_v53  ;;  %v2220_v53 = vcombine.high %v19_v48, %v31_v49  ;;  %v2844_v48 = vld [vmem:[%s3566_s1 + $0x460] sm:$0xff]  }
  0x2f   :  { %v2845_v49 = vld [vmem:[%s3566_s1 + $0x4e0] sm:$0xff]  }
  0x30   :  { %2487 = vmatpush3.bf16.msra.mxu0 %v2746_v54  ;;  %v2221_v54 = vcombine.low %v20_v50, %v32_v51 }
  0x31   :  { %2509 = vmatpush3.bf16.msra.mxu1 %v2747_v55  ;;  %2488 = vmatprep.subr.bf16.mxu0 %v2748_v56  ;;  %v2222_v55 = vcombine.high %v20_v50, %v32_v51  ;;  %v2796_v56 = vld [vmem:[%s3566_s1 + $0x340] sm:$0xff]  }
  0x32   :  { %2510 = vmatprep.subr.bf16.mxu1 %v2749_v57  ;;  %v2797_v57 = vld [vmem:[%s3566_s1 + $0x3c0] sm:$0xff]  }
  0x33   :  { %v2846_v50 = vld [vmem:[%s3566_s1 + $0x420] sm:$0xff]  }
  0x34   :  { %2489 = vmatpush3.bf16.msra.mxu0 %v2750_v58  ;;  %v2798_v58 = vld [vmem:[%s3566_s1 + $0x300] sm:$0xff]  }
  0x35   :  { %2511 = vmatpush3.bf16.msra.mxu1 %v2751_v59  ;;  %2490 = vmatprep.subr.bf16.mxu0 %v2752_v60  ;;  %v2799_v59 = vld [vmem:[%s3566_s1 + $0x380] sm:$0xff]   ;;  %v2800_v60 = vld [vmem:[%s3566_s1 + $0x348] sm:$0xff]  }
  0x36   :  { %2512 = vmatprep.subr.bf16.mxu1 %v2753_v61  ;;  %v2801_v61 = vld [vmem:[%s3566_s1 + $0x3c8] sm:$0xff]   ;;  %v2847_v51 = vld [vmem:[%s3566_s1 + $0x4a0] sm:$0xff]  }
  0x38   :  { %2491 = vmatpush3.bf16.msra.mxu0 %v2754_v62  ;;  %v2802_v62 = vld [vmem:[%s3566_s1 + $0x308] sm:$0xff]  }
  0x39   :  { %2513 = vmatpush3.bf16.msra.mxu1 %v2755_v63  ;;  %2492 = vmatprep.subr.bf16.mxu0 %v2756_v0  ;;  %v2803_v63 = vld [vmem:[%s3566_s1 + $0x388] sm:$0xff]   ;;  %v2804_v0 = vld [vmem:[%s3566_s1 + $0x350] sm:$0xff]  }
  0x3a   :  { %2514 = vmatprep.subr.bf16.mxu1 %v2757_v1  ;;  %v2805_v1 = vld [vmem:[%s3566_s1 + $0x3d0] sm:$0xff]  }
  0x3c   :  { %2493 = vmatpush3.bf16.msra.mxu0 %v2758_v2  ;;  %v2806_v2 = vld [vmem:[%s3566_s1 + $0x310] sm:$0xff]  }
  0x3d   :  { %2515 = vmatpush3.bf16.msra.mxu1 %v2759_v3  ;;  %2494 = vmatprep.subr.bf16.mxu0 %v2760_v4  ;;  %v2807_v3 = vld [vmem:[%s3566_s1 + $0x390] sm:$0xff]   ;;  %v2808_v4 = vld [vmem:[%s3566_s1 + $0x358] sm:$0xff]  }
  0x3e   :  { %2516 = vmatprep.subr.bf16.mxu1 %v2761_v5  ;;  %v2809_v5 = vld [vmem:[%s3566_s1 + $0x3d8] sm:$0xff]  }
  0x40   :  { %2495 = vmatpush3.bf16.msra.mxu0 %v2762_v6  ;;  %v2810_v6 = vld [vmem:[%s3566_s1 + $0x318] sm:$0xff]  }
  0x41   :  { %2517 = vmatpush3.bf16.msra.mxu1 %v2763_v7  ;;  %2524 = vmatprep.subr.bf16.mxu0 %v2764_v16  ;;  %v2811_v7 = vld [vmem:[%s3566_s1 + $0x398] sm:$0xff]   ;;  %v2820_v16 = vld [vmem:[%s3566_s1 + $0x370] sm:$0xff]  }
  0x42   :  { %2546 = vmatprep.subr.bf16.mxu1 %v2765_v17  ;;  %v2821_v17 = vld [vmem:[%s3566_s1 + $0x3f0] sm:$0xff]  }
  0x43   :  { %1817 = vmatmul.mubr.bf16.vlgmr.msra.gmra.mrb[4].mxu0 %v2215_v10  ;;  %v2814_v10 = vld [vmem:[%s3566_s1 + $0x320] sm:$0xff]  }
  0x44   :  { %1858 = vmatmul.mubr.bf16.vlgmr.msra.gmra.mrb[4].mxu1 %v2217_v14  ;;  %2525 = vmatpush3.bf16.msra.mxu0 %v2766_v18  ;;  %v2818_v14 = vld [vmem:[%s3566_s1 + $0x328] sm:$0xff]   ;;  %v2822_v18 = vld [vmem:[%s3566_s1 + $0x330] sm:$0xff]  }
  0x45   :  { %2547 = vmatpush3.bf16.msra.mxu1 %v2767_v19  ;;  %2526 = vmatprep.subr.bf16.mxu0 %v2768_v20  ;;  %v2823_v19 = vld [vmem:[%s3566_s1 + $0x3b0] sm:$0xff]   ;;  %v2824_v20 = vld [vmem:[%s3566_s1 + $0x378] sm:$0xff]  }
  0x46   :  { %2548 = vmatprep.subr.bf16.mxu1 %v2769_v21  ;;  %1898 = vmatprep.mubr.bf16.mxu0 %v2220_v53  ;;  %v2825_v21 = vld [vmem:[%s3566_s1 + $0x3f8] sm:$0xff]   ;;  %v2849_v53 = vld [vmem:[%s3566_s1 + $0x4e8] sm:$0xff]  }
  0x47   :  { %1939 = vmatprep.mubr.bf16.mxu1 %v2222_v55  ;;  %v2851_v55 = vld [vmem:[%s3566_s1 + $0x4a8] sm:$0xff]  }
  0x48   :  { %2527 = vmatpush3.bf16.msra.mxu0 %v2770_v22  ;;  %v2826_v22 = vld [vmem:[%s3566_s1 + $0x338] sm:$0xff]  }
  0x49   :  { %2549 = vmatpush3.bf16.msra.mxu1 %v2771_v23  ;;  %2528 = vmatprep.subr.bf16.mxu0 %v2772_v24  ;;  %v2827_v23 = vld [vmem:[%s3566_s1 + $0x3b8] sm:$0xff]   ;;  %v21_v24 = vld [vmem:[%s3567_s0 + $0x30] sm:$0xff] }
  0x4a   :  { %2550 = vmatprep.subr.bf16.mxu1 %v2773_v25  ;;  %v33_v25 = vld [vmem:[%s3567_s0 + $0x90] sm:$0xff] }
  0x4c   :  { %2529 = vmatpush3.bf16.msra.mxu0 %v2774_v26  ;;  %v22_v26 = vld [vmem:[%s3567_s0 + $0x38] sm:$0xff] }
  0x4d   :  { %2551 = vmatpush3.bf16.msra.mxu1 %v2775_v27  ;;  %2530 = vmatprep.subr.bf16.mxu0 %v2776_v28  ;;  %v2223_v27 = vcombine.low %v21_v24, %v33_v25  ;;  %v2224_v28 = vcombine.high %v21_v24, %v33_v25  ;;  %v2876_v24 = vld [vmem:[%s3566_s1 + $0x560] sm:$0xff]  }
  0x4e   :  { %2552 = vmatprep.subr.bf16.mxu1 %v2777_v29  ;;  %v34_v29 = vld [vmem:[%s3567_s0 + $0x98] sm:$0xff]  ;;  %v2877_v25 = vld [vmem:[%s3566_s1 + $0x5e0] sm:$0xff]  }
  0x50   :  { %2531 = vmatpush3.bf16.msra.mxu0 %v2778_v30  ;;  %v2225_v30 = vcombine.low %v22_v26, %v34_v29 }
  0x51   :  { %2553 = vmatpush3.bf16.msra.mxu1 %v2779_v31  ;;  %2532 = vmatprep.subr.bf16.mxu0 %v2780_v32  ;;  %v2226_v31 = vcombine.high %v22_v26, %v34_v29  ;;  %v2828_v32 = vld [vmem:[%s3566_s1 + $0x440] sm:$0xff]   ;;  %v2881_v29 = vld [vmem:[%s3566_s1 + $0x5e8] sm:$0xff]  }
  0x52   :  { %2554 = vmatprep.subr.bf16.mxu1 %v2781_v33  ;;  %v2829_v33 = vld [vmem:[%s3566_s1 + $0x4c0] sm:$0xff]  }
  0x53   :  { %v2878_v26 = vld [vmem:[%s3566_s1 + $0x520] sm:$0xff]  }
  0x54   :  { %2533 = vmatpush3.bf16.msra.mxu0 %v2782_v34  ;;  %v2830_v34 = vld [vmem:[%s3566_s1 + $0x400] sm:$0xff]  }
  0x55   :  { %2555 = vmatpush3.bf16.msra.mxu1 %v2783_v35  ;;  %2534 = vmatprep.subr.bf16.mxu0 %v2784_v36  ;;  %v2831_v35 = vld [vmem:[%s3566_s1 + $0x480] sm:$0xff]   ;;  %v2832_v36 = vld [vmem:[%s3566_s1 + $0x448] sm:$0xff]  }
  0x56   :  { %2556 = vmatprep.subr.bf16.mxu1 %v2785_v37  ;;  %v2833_v37 = vld [vmem:[%s3566_s1 + $0x4c8] sm:$0xff]  }
  0x58   :  { %2535 = vmatpush3.bf16.msra.mxu0 %v2786_v38  ;;  %v2834_v38 = vld [vmem:[%s3566_s1 + $0x408] sm:$0xff]  }
  0x59   :  { %2557 = vmatpush3.bf16.msra.mxu1 %v2787_v39  ;;  %2536 = vmatprep.subr.bf16.mxu0 %v2788_v40  ;;  %v2835_v39 = vld [vmem:[%s3566_s1 + $0x488] sm:$0xff]   ;;  %v2836_v40 = vld [vmem:[%s3566_s1 + $0x450] sm:$0xff]  }
  0x5a   :  { %2558 = vmatprep.subr.bf16.mxu1 %v2789_v41  ;;  %v2837_v41 = vld [vmem:[%s3566_s1 + $0x4d0] sm:$0xff]  }
  0x5c   :  { %2537 = vmatpush3.bf16.msra.mxu0 %v2790_v42  ;;  %v2838_v42 = vld [vmem:[%s3566_s1 + $0x410] sm:$0xff]  }
  0x5d   :  { %2559 = vmatpush3.bf16.msra.mxu1 %v2791_v43  ;;  %2538 = vmatprep.subr.bf16.mxu0 %v2792_v44  ;;  %v2839_v43 = vld [vmem:[%s3566_s1 + $0x490] sm:$0xff]   ;;  %v2840_v44 = vld [vmem:[%s3566_s1 + $0x458] sm:$0xff]  }
  0x5e   :  { %2560 = vmatprep.subr.bf16.mxu1 %v2793_v45  ;;  %v2841_v45 = vld [vmem:[%s3566_s1 + $0x4d8] sm:$0xff]  }
  0x60   :  { %2539 = vmatpush3.bf16.msra.mxu0 %v2794_v46  ;;  %v2842_v46 = vld [vmem:[%s3566_s1 + $0x418] sm:$0xff]  }
  0x61   :  { %2561 = vmatpush3.bf16.msra.mxu1 %v2795_v47  ;;  %2568 = vmatprep.subr.bf16.mxu0 %v2796_v56  ;;  %v2843_v47 = vld [vmem:[%s3566_s1 + $0x498] sm:$0xff]   ;;  %v2852_v56 = vld [vmem:[%s3566_s1 + $0x470] sm:$0xff]  }
  0x62   :  { %2590 = vmatprep.subr.bf16.mxu1 %v2797_v57  ;;  %v2853_v57 = vld [vmem:[%s3566_s1 + $0x4f0] sm:$0xff]  }
  0x63   :  { %1899 = vmatmul.mubr.bf16.vlgmr.msra.gmra.mrb[8].mxu0 %v2219_v52  ;;  %v2848_v52 = vld [vmem:[%s3566_s1 + $0x468] sm:$0xff]  }
  0x64   :  { %1940 = vmatmul.mubr.bf16.vlgmr.msra.gmra.mrb[8].mxu1 %v2221_v54  ;;  %2569 = vmatpush3.bf16.msra.mxu0 %v2798_v58  ;;  %v2850_v54 = vld [vmem:[%s3566_s1 + $0x428] sm:$0xff]   ;;  %v2854_v58 = vld [vmem:[%s3566_s1 + $0x430] sm:$0xff]  }
  0x65   :  { %2591 = vmatpush3.bf16.msra.mxu1 %v2799_v59  ;;  %2570 = vmatprep.subr.bf16.mxu0 %v2800_v60  ;;  %v2855_v59 = vld [vmem:[%s3566_s1 + $0x4b0] sm:$0xff]   ;;  %v2856_v60 = vld [vmem:[%s3566_s1 + $0x478] sm:$0xff]  }
  0x66   :  { %2592 = vmatprep.subr.bf16.mxu1 %v2801_v61  ;;  %1980 = vmatprep.mubr.bf16.mxu0 %v2224_v28  ;;  %v2857_v61 = vld [vmem:[%s3566_s1 + $0x4f8] sm:$0xff]   ;;  %v2880_v28 = vld [vmem:[%s3566_s1 + $0x568] sm:$0xff]  }
  0x67   :  { %2021 = vmatprep.mubr.bf16.mxu1 %v2226_v31  ;;  %v2883_v31 = vld [vmem:[%s3566_s1 + $0x5a8] sm:$0xff]  }
  0x68   :  { %2571 = vmatpush3.bf16.msra.mxu0 %v2802_v62  ;;  %v2858_v62 = vld [vmem:[%s3566_s1 + $0x438] sm:$0xff]  }
  0x69   :  { %2593 = vmatpush3.bf16.msra.mxu1 %v2803_v63  ;;  %2572 = vmatprep.subr.bf16.mxu0 %v2804_v0  ;;  %v2859_v63 = vld [vmem:[%s3566_s1 + $0x4b8] sm:$0xff]   ;;  %v23_v0 = vld [vmem:[%s3567_s0 + $0x40] sm:$0xff] }
  0x6a   :  { %2594 = vmatprep.subr.bf16.mxu1 %v2805_v1  ;;  %v35_v1 = vld [vmem:[%s3567_s0 + $0xa0] sm:$0xff] }
  0x6c   :  { %2573 = vmatpush3.bf16.msra.mxu0 %v2806_v2  ;;  %v2227_v2 = vcombine.low %v23_v0, %v35_v1 }
  0x6d   :  { %2595 = vmatpush3.bf16.msra.mxu1 %v2807_v3  ;;  %2574 = vmatprep.subr.bf16.mxu0 %v2808_v4  ;;  %v2228_v3 = vcombine.high %v23_v0, %v35_v1  ;;  %v24_v4 = vld [vmem:[%s3567_s0 + $0x48] sm:$0xff] }
  0x6e   :  { %2596 = vmatprep.subr.bf16.mxu1 %v2809_v5  ;;  %v36_v5 = vld [vmem:[%s3567_s0 + $0xa8] sm:$0xff] }
  0x70   :  { %2575 = vmatpush3.bf16.msra.mxu0 %v2810_v6  ;;  %v2229_v6 = vcombine.low %v24_v4, %v36_v5 }
  0x71   :  { %2597 = vmatpush3.bf16.msra.mxu1 %v2811_v7  ;;  %2576 = vmatprep.subr.bf16.mxu0 %v2812_v8  ;;  %v2230_v7 = vcombine.high %v24_v4, %v36_v5  ;;  %v2860_v8 = vld [vmem:[%s3566_s1 + $0x540] sm:$0xff]  }
  0x72   :  { %2598 = vmatprep.subr.bf16.mxu1 %v2813_v9  ;;  %v2861_v9 = vld [vmem:[%s3566_s1 + $0x5c0] sm:$0xff]  }
  0x74   :  { %2577 = vmatpush3.bf16.msra.mxu0 %v2814_v10  ;;  %v2862_v10 = vld [vmem:[%s3566_s1 + $0x500] sm:$0xff]  }
  0x75   :  { %2599 = vmatpush3.bf16.msra.mxu1 %v2815_v11  ;;  %2578 = vmatprep.subr.bf16.mxu0 %v2816_v12  ;;  %v2863_v11 = vld [vmem:[%s3566_s1 + $0x580] sm:$0xff]   ;;  %v2864_v12 = vld [vmem:[%s3566_s1 + $0x548] sm:$0xff]  }
  0x76   :  { %2600 = vmatprep.subr.bf16.mxu1 %v2817_v13  ;;  %v2865_v13 = vld [vmem:[%s3566_s1 + $0x5c8] sm:$0xff]  }
  0x78   :  { %2579 = vmatpush3.bf16.msra.mxu0 %v2818_v14  ;;  %v2866_v14 = vld [vmem:[%s3566_s1 + $0x508] sm:$0xff]  }
  0x79   :  { %2601 = vmatpush3.bf16.msra.mxu1 %v2819_v15  ;;  %2580 = vmatprep.subr.bf16.mxu0 %v2820_v16  ;;  %v2867_v15 = vld [vmem:[%s3566_s1 + $0x588] sm:$0xff]   ;;  %v2868_v16 = vld [vmem:[%s3566_s1 + $0x550] sm:$0xff]  }
  0x7a   :  { %2602 = vmatprep.subr.bf16.mxu1 %v2821_v17  ;;  %v2869_v17 = vld [vmem:[%s3566_s1 + $0x5d0] sm:$0xff]  }
  0x7c   :  { %2581 = vmatpush3.bf16.msra.mxu0 %v2822_v18  ;;  %v2870_v18 = vld [vmem:[%s3566_s1 + $0x510] sm:$0xff]  }
  0x7d   :  { %2603 = vmatpush3.bf16.msra.mxu1 %v2823_v19  ;;  %2582 = vmatprep.subr.bf16.mxu0 %v2824_v20  ;;  %v2871_v19 = vld [vmem:[%s3566_s1 + $0x590] sm:$0xff]   ;;  %v2872_v20 = vld [vmem:[%s3566_s1 + $0x558] sm:$0xff]  }
  0x7e   :  { %2604 = vmatprep.subr.bf16.mxu1 %v2825_v21  ;;  %v2873_v21 = vld [vmem:[%s3566_s1 + $0x5d8] sm:$0xff]  }
  0x80   :  { %2583 = vmatpush3.bf16.msra.mxu0 %v2826_v22  ;;  %v2874_v22 = vld [vmem:[%s3566_s1 + $0x518] sm:$0xff]  }
  0x81   :  { %2605 = vmatpush3.bf16.msra.mxu1 %v2827_v23  ;;  %2612 = vmatprep.subr.bf16.mxu0 %v2828_v32  ;;  %v2875_v23 = vld [vmem:[%s3566_s1 + $0x598] sm:$0xff]   ;;  %v2884_v32 = vld [vmem:[%s3566_s1 + $0x570] sm:$0xff]  }
  0x82   :  { %2634 = vmatprep.subr.bf16.mxu1 %v2829_v33  ;;  %v2885_v33 = vld [vmem:[%s3566_s1 + $0x5f0] sm:$0xff]  }
  0x83   :  { %1981 = vmatmul.mubr.bf16.vlgmr.msra.gmra.mrb[12].mxu0 %v2223_v27  ;;  %v2879_v27 = vld [vmem:[%s3566_s1 + $0x5a0] sm:$0xff]  }
  0x84   :  { %2022 = vmatmul.mubr.bf16.vlgmr.msra.gmra.mrb[12].mxu1 %v2225_v30  ;;  %2613 = vmatpush3.bf16.msra.mxu0 %v2830_v34  ;;  %v2882_v30 = vld [vmem:[%s3566_s1 + $0x528] sm:$0xff]   ;;  %v2886_v34 = vld [vmem:[%s3566_s1 + $0x530] sm:$0xff]  }
  0x85   :  { %2635 = vmatpush3.bf16.msra.mxu1 %v2831_v35  ;;  %2614 = vmatprep.subr.bf16.mxu0 %v2832_v36  ;;  %v2887_v35 = vld [vmem:[%s3566_s1 + $0x5b0] sm:$0xff]   ;;  %v2888_v36 = vld [vmem:[%s3566_s1 + $0x578] sm:$0xff]  }
  0x86   :  { %2636 = vmatprep.subr.bf16.mxu1 %v2833_v37  ;;  %2062 = vmatprep.mubr.bf16.mxu0 %v2228_v3  ;;  %v2889_v37 = vld [vmem:[%s3566_s1 + $0x5f8] sm:$0xff]  }
  0x87   :  { %2103 = vmatprep.mubr.bf16.mxu1 %v2230_v7 }
  0x88   :  { %2615 = vmatpush3.bf16.msra.mxu0 %v2834_v38  ;;  %v2890_v38 = vld [vmem:[%s3566_s1 + $0x538] sm:$0xff]  }
  0x89   :  { %2637 = vmatpush3.bf16.msra.mxu1 %v2835_v39  ;;  %2616 = vmatprep.subr.bf16.mxu0 %v2836_v40  ;;  %v2891_v39 = vld [vmem:[%s3566_s1 + $0x5b8] sm:$0xff]   ;;  %v25_v40 = vld [vmem:[%s3567_s0 + $0x50] sm:$0xff] }
  0x8a   :  { %2638 = vmatprep.subr.bf16.mxu1 %v2837_v41  ;;  %v37_v41 = vld [vmem:[%s3567_s0 + $0xb0] sm:$0xff] }
  0x8c   :  { %2617 = vmatpush3.bf16.msra.mxu0 %v2838_v42  ;;  %v26_v42 = vld [vmem:[%s3567_s0 + $0x58] sm:$0xff] }
  0x8d   :  { %2639 = vmatpush3.bf16.msra.mxu1 %v2839_v43  ;;  %2618 = vmatprep.subr.bf16.mxu0 %v2840_v44  ;;  %v38_v43 = vld [vmem:[%s3567_s0 + $0xb8] sm:$0xff]  ;;  %v2231_v44 = vcombine.low %v25_v40, %v37_v41 }
  0x8e   :  { %2640 = vmatprep.subr.bf16.mxu1 %v2841_v45  ;;  %v2232_v45 = vcombine.high %v25_v40, %v37_v41 }
  0x90   :  { %2619 = vmatpush3.bf16.msra.mxu0 %v2842_v46  ;;  %v2233_v46 = vcombine.low %v26_v42, %v38_v43 }
  0x91   :  { %2641 = vmatpush3.bf16.msra.mxu1 %v2843_v47  ;;  %2620 = vmatprep.subr.bf16.mxu0 %v2844_v48  ;;  %v2234_v47 = vcombine.high %v26_v42, %v38_v43 }
  0x92   :  { %2642 = vmatprep.subr.bf16.mxu1 %v2845_v49 }
  0x94   :  { %2621 = vmatpush3.bf16.msra.mxu0 %v2846_v50  ;;  %v2210_v50 = vld [vmem:[%s3568_s2] ss:$0 sm:$0xff] }
  0x95   :  { %2643 = vmatpush3.bf16.msra.mxu1 %v2847_v51  ;;  %2622 = vmatprep.subr.bf16.mxu0 %v2848_v52 }
  0x96   :  { %2644 = vmatprep.subr.bf16.mxu1 %v2849_v53 }
  0x98   :  { %2623 = vmatpush3.bf16.msra.mxu0 %v2850_v54 }
  0x99   :  { %2645 = vmatpush3.bf16.msra.mxu1 %v2851_v55  ;;  %2624 = vmatprep.subr.bf16.mxu0 %v2852_v56 }
  0x9a   :  { %2646 = vmatprep.subr.bf16.mxu1 %v2853_v57 }
  0x9c   :  { %2625 = vmatpush3.bf16.msra.mxu0 %v2854_v58 }
  0x9d   :  { %2647 = vmatpush3.bf16.msra.mxu1 %v2855_v59  ;;  %2626 = vmatprep.subr.bf16.mxu0 %v2856_v60 }
  0x9e   :  { %2648 = vmatprep.subr.bf16.mxu1 %v2857_v61 }
  0xa0   :  { %2627 = vmatpush3.bf16.msra.mxu0 %v2858_v62 }
  0xa1   :  { %2649 = vmatpush3.bf16.msra.mxu1 %v2859_v63  ;;  %2656 = vmatprep.subr.bf16.mxu0 %v2860_v8 }
  0xa2   :  { %2678 = vmatprep.subr.bf16.mxu1 %v2861_v9 }
  0xa3   :  { %2063 = vmatmul.mubr.bf16.vlgmr.msra.gmra.mrb[16].mxu0 %v2227_v2 }
  0xa4   :  { %2104 = vmatmul.mubr.bf16.vlgmr.msra.gmra.mrb[16].mxu1 %v2229_v6  ;;  %2657 = vmatpush3.bf16.msra.mxu0 %v2862_v10 }
  0xa5   :  { %2679 = vmatpush3.bf16.msra.mxu1 %v2863_v11  ;;  %2658 = vmatprep.subr.bf16.mxu0 %v2864_v12 }
  0xa6   :  { %2680 = vmatprep.subr.bf16.mxu1 %v2865_v13  ;;  %2144 = vmatprep.mubr.bf16.mxu0 %v2232_v45 }
  0xa7   :  { %2185 = vmatprep.mubr.bf16.mxu1 %v2234_v47 }
  0xa8   :  { %2659 = vmatpush3.bf16.msra.mxu0 %v2866_v14 }
  0xa9   :  { %2681 = vmatpush3.bf16.msra.mxu1 %v2867_v15  ;;  %2660 = vmatprep.subr.bf16.mxu0 %v2868_v16 }
  0xaa   :  { %2682 = vmatprep.subr.bf16.mxu1 %v2869_v17 }
  0xac   :  { %2661 = vmatpush3.bf16.msra.mxu0 %v2870_v18 }
  0xad   :  { %2683 = vmatpush3.bf16.msra.mxu1 %v2871_v19  ;;  %2662 = vmatprep.subr.bf16.mxu0 %v2872_v20 }
  0xae   :  { %2684 = vmatprep.subr.bf16.mxu1 %v2873_v21 }
  0xb0   :  { %2663 = vmatpush3.bf16.msra.mxu0 %v2874_v22 }
  0xb1   :  { %2685 = vmatpush3.bf16.msra.mxu1 %v2875_v23  ;;  %2664 = vmatprep.subr.bf16.mxu0 %v2876_v24 }
  0xb2   :  { %2686 = vmatprep.subr.bf16.mxu1 %v2877_v25 }
  0xb4   :  { %2665 = vmatpush3.bf16.msra.mxu0 %v2878_v26 }
  0xb5   :  { %2687 = vmatpush3.bf16.msra.mxu1 %v2879_v27  ;;  %2666 = vmatprep.subr.bf16.mxu0 %v2880_v28 }
  0xb6   :  { %2688 = vmatprep.subr.bf16.mxu1 %v2881_v29 }
  0xb8   :  { %2667 = vmatpush3.bf16.msra.mxu0 %v2882_v30 }
  0xb9   :  { %2689 = vmatpush3.bf16.msra.mxu1 %v2883_v31  ;;  %2668 = vmatprep.subr.bf16.mxu0 %v2884_v32 }
  0xba   :  { %2690 = vmatprep.subr.bf16.mxu1 %v2885_v33 }
  0xbc   :  { %2669 = vmatpush3.bf16.msra.mxu0 %v2886_v34 }
  0xbd   :  { %2691 = vmatpush3.bf16.msra.mxu1 %v2887_v35  ;;  %2670 = vmatprep.subr.bf16.mxu0 %v2888_v36 }
  0xbe   :  { %2692 = vmatprep.subr.bf16.mxu1 %v2889_v37 }
  0xc0   :  { %2671 = vmatpush3.bf16.msra.mxu0 %v2890_v38 }
  0xc1   :  { %2693 = vmatpush3.bf16.msra.mxu1 %v2891_v39 }
  0xc3   :  { %2145 = vmatmul.mubr.bf16.vlgmr.msra.gmra.mrb[20].mxu0 %v2231_v44 }
  0xc4   :  { %2186 = vmatmul.mubr.bf16.vlgmr.msra.gmra.mrb[20].mxu1 %v2233_v46 }
  0xf6   :  { %v2452_v48 = vpop.f32.mrb[0].mxu0 }
  0xf7   :  { %v2474_v49 = vpop.f32.mrb[0].mxu1  ;;  %v2453_v51 = vpop.f32.mrb[1].mxu0 }
  0xf8   :  { %v2454_v52 = vadd.f32 %v2453_v51, %v2452_v48  ;;  %v2475_v53 = vpop.f32.mrb[1].mxu1  ;;  %v2455_v54 = vpop.f32.mrb[2].mxu0 }
  0xf9   :  { %v2476_v55 = vadd.f32 %v2475_v53, %v2474_v49  ;;  %v2477_v56 = vpop.f32.mrb[2].mxu1  ;;  %v2456_v57 = vpop.f32.mrb[3].mxu0 }
  0xfa   :  { %v1737_v58 = vadd.f32 %v2454_v52, %v2210_v50  ;;  %v2457_v59 = vadd.f32 %v2456_v57, %v2455_v54  ;;  %v2478_v60 = vpop.f32.mrb[3].mxu1 }
  0xfb   :  { %v2479_v61 = vadd.f32 %v2478_v60, %v2477_v56 }
  0xfc   :  { %v1778_v62 = vadd.f32 %v2476_v55, %v1737_v58  ;;  %v1740_v63 = vadd.f32 %v2457_v59, %v2210_v50 }
  0xfe   :  { %v1781_v0 = vadd.f32 %v2479_v61, %v1740_v63 }
 0x116   :  { %v2496_v1 = vpop.f32.mrb[4].mxu0 }
 0x117   :  { %v2518_v2 = vpop.f32.mrb[4].mxu1  ;;  %v2497_v3 = vpop.f32.mrb[5].mxu0 }
 0x118   :  { %v2498_v4 = vadd.f32 %v2497_v3, %v2496_v1  ;;  %v2519_v5 = vpop.f32.mrb[5].mxu1  ;;  %v2499_v6 = vpop.f32.mrb[6].mxu0 }
 0x119   :  { %v2520_v7 = vadd.f32 %v2519_v5, %v2518_v2  ;;  %v2521_v8 = vpop.f32.mrb[6].mxu1  ;;  %v2500_v9 = vpop.f32.mrb[7].mxu0 }
 0x11a   :  { %v1819_v10 = vadd.f32 %v2498_v4, %v1778_v62  ;;  %v2501_v11 = vadd.f32 %v2500_v9, %v2499_v6  ;;  %v2522_v12 = vpop.f32.mrb[7].mxu1 }
 0x11b   :  { %v2523_v13 = vadd.f32 %v2522_v12, %v2521_v8 }
 0x11c   :  { %v1860_v14 = vadd.f32 %v2520_v7, %v1819_v10  ;;  %v1822_v15 = vadd.f32 %v2501_v11, %v1781_v0 }
 0x11e   :  { %v1863_v16 = vadd.f32 %v2523_v13, %v1822_v15 }
 0x136   :  { %v2540_v17 = vpop.f32.mrb[8].mxu0 }
 0x137   :  { %v2562_v18 = vpop.f32.mrb[8].mxu1  ;;  %v2541_v19 = vpop.f32.mrb[9].mxu0 }
 0x138   :  { %v2563_v20 = vpop.f32.mrb[9].mxu1  ;;  %v2542_v21 = vadd.f32 %v2541_v19, %v2540_v17  ;;  %v2543_v23 = vpop.f32.mrb[10].mxu0 }
 0x139   :  { %v2564_v22 = vadd.f32 %v2563_v20, %v2562_v18  ;;  %v2565_v24 = vpop.f32.mrb[10].mxu1  ;;  %v2544_v25 = vpop.f32.mrb[11].mxu0 }
 0x13a   :  { %v2566_v26 = vpop.f32.mrb[11].mxu1  ;;  %v1901_v27 = vadd.f32 %v2542_v21, %v1860_v14  ;;  %v2545_v28 = vadd.f32 %v2544_v25, %v2543_v23 }
 0x13b   :  { %v2567_v29 = vadd.f32 %v2566_v26, %v2565_v24 }
 0x13c   :  { %v1942_v30 = vadd.f32 %v2564_v22, %v1901_v27  ;;  %v1904_v31 = vadd.f32 %v2545_v28, %v1863_v16 }
 0x13e   :  { %v1945_v32 = vadd.f32 %v2567_v29, %v1904_v31 }
 0x156   :  { %v2584_v33 = vpop.f32.mrb[12].mxu0 }
 0x157   :  { %v2606_v34 = vpop.f32.mrb[12].mxu1  ;;  %v2585_v35 = vpop.f32.mrb[13].mxu0 }
 0x158   :  { %v2586_v36 = vadd.f32 %v2585_v35, %v2584_v33  ;;  %v2607_v37 = vpop.f32.mrb[13].mxu1  ;;  %v2587_v38 = vpop.f32.mrb[14].mxu0 }
 0x159   :  { %v2608_v39 = vadd.f32 %v2607_v37, %v2606_v34  ;;  %v2609_v40 = vpop.f32.mrb[14].mxu1  ;;  %v2588_v41 = vpop.f32.mrb[15].mxu0 }
 0x15a   :  { %v1983_v42 = vadd.f32 %v2586_v36, %v1942_v30  ;;  %v2589_v43 = vadd.f32 %v2588_v41, %v2587_v38  ;;  %v2610_v44 = vpop.f32.mrb[15].mxu1 }
 0x15b   :  { %v2611_v45 = vadd.f32 %v2610_v44, %v2609_v40 }
 0x15c   :  { %v2024_v46 = vadd.f32 %v2608_v39, %v1983_v42  ;;  %v1986_v47 = vadd.f32 %v2589_v43, %v1945_v32 }
 0x15e   :  { %v2027_v48 = vadd.f32 %v2611_v45, %v1986_v47 }
 0x176   :  { %v2628_v49 = vpop.f32.mrb[16].mxu0 }
 0x177   :  { %v2650_v50 = vpop.f32.mrb[16].mxu1  ;;  %v2629_v51 = vpop.f32.mrb[17].mxu0 }
 0x178   :  { %v2630_v52 = vadd.f32 %v2629_v51, %v2628_v49  ;;  %v2651_v53 = vpop.f32.mrb[17].mxu1  ;;  %v2631_v54 = vpop.f32.mrb[18].mxu0 }
 0x179   :  { %v2652_v55 = vadd.f32 %v2651_v53, %v2650_v50  ;;  %v2653_v56 = vpop.f32.mrb[18].mxu1  ;;  %v2632_v57 = vpop.f32.mrb[19].mxu0 }
 0x17a   :  { %v2065_v58 = vadd.f32 %v2630_v52, %v2024_v46  ;;  %v2633_v59 = vadd.f32 %v2632_v57, %v2631_v54  ;;  %v2654_v60 = vpop.f32.mrb[19].mxu1 }
 0x17b   :  { %v2655_v61 = vadd.f32 %v2654_v60, %v2653_v56 }
 0x17c   :  { %v2106_v62 = vadd.f32 %v2652_v55, %v2065_v58  ;;  %v2068_v63 = vadd.f32 %v2633_v59, %v2027_v48 }
 0x17e   :  { %v2109_v0 = vadd.f32 %v2655_v61, %v2068_v63 }
 0x196   :  { %v2672_v1 = vpop.f32.mrb[20].mxu0 }
 0x197   :  { %v2694_v2 = vpop.f32.mrb[20].mxu1  ;;  %v2673_v3 = vpop.f32.mrb[21].mxu0 }
 0x198   :  { %v2695_v4 = vpop.f32.mrb[21].mxu1  ;;  %v2674_v5 = vadd.f32 %v2673_v3, %v2672_v1  ;;  %v2675_v7 = vpop.f32.mrb[22].mxu0 }
 0x199   :  { %v2696_v6 = vadd.f32 %v2695_v4, %v2694_v2  ;;  %v2697_v8 = vpop.f32.mrb[22].mxu1  ;;  %v2676_v9 = vpop.f32.mrb[23].mxu0 }
 0x19a   :  { %v2698_v10 = vpop.f32.mrb[23].mxu1  ;;  %v2147_v11 = vadd.f32 %v2674_v5, %v2106_v62  ;;  %v2677_v12 = vadd.f32 %v2676_v9, %v2675_v7 }
 0x19b   :  { %v2699_v13 = vadd.f32 %v2698_v10, %v2697_v8 }
 0x19c   :  { %v2188_v14 = vadd.f32 %v2696_v6, %v2147_v11  ;;  %v2150_v15 = vadd.f32 %v2677_v12, %v2109_v0 }
 0x19e   :  { %v2191_v16 = vadd.f32 %v2699_v13, %v2150_v15  ;;  %v2194_v17 = vmax.f32 %v2188_v14, 0.0 }
 0x1a0   :  { %v2195_v18 = vmax.f32 %v2191_v16, 0.0 }
 0x1a2   :  { %v2434_v19 = vpack.c.bf16 %v2195_v18, %v2194_v17 }
 0x1a4   :  { %2435 = vst [vmem:[%s3569_s3] sm:$0xff] %v2434_v19  }

</bundles_post_ra>
